<compile_context>
chip_gen: v7x
topology: tpu7x:2x2x1
jax: 0.10.0
libtpu: 0.0.40
codegen_flags: <defaults>
</compile_context>

<pallas_src>
import math
import functools

import jax
import jax.numpy as jnp
from jax.experimental import pallas as pl
from jax.experimental.pallas import tpu as pltpu

LN_EPS = 1e-5
VMEM_LIMIT = 32 * 1024 * 1024
TM, TN, TK = 256, 256, 512          # tile targets (multiples of 8 / 128)


def _tile(dim, target):
    """Return (tile, padded_dim): the full dim if it is small, else `target`
    with the dim padded up to a multiple of `target` (keeps (8,128) alignment)."""
    if dim <= target:
        return dim, dim
    return target, dim + ((-dim) % target)


def _pad2(x, rows, cols):
    r, c = x.shape
    if (r, c) == (rows, cols):
        return x
    return jnp.pad(x, ((0, rows - r), (0, cols - c)))


# ----------------------- tiled matmul (+bias, optional ReLU) -----------------------

def _matmul_kernel(x_ref, w_ref, b_ref, o_ref, acc_ref, *, activation):
    @pl.when(pl.program_id(2) == 0)
    def _():
        acc_ref[...] = jnp.zeros_like(acc_ref)

    acc_ref[...] += jnp.dot(x_ref[...], w_ref[...],
                            preferred_element_type=jnp.float32)

    @pl.when(pl.program_id(2) == pl.num_programs(2) - 1)
    def _():
        r = acc_ref[...] + b_ref[...].astype(jnp.float32)
        if activation == "relu":
            r = jnp.maximum(r, 0.0)
        o_ref[...] = r.astype(o_ref.dtype)


def matmul_bias(x, w, b, *, activation=None, out_dtype=jnp.bfloat16):
    """x:(M,K) bf16, w:(K,N) bf16 (pre-transposed), b:(N,) f32 -> (M,N)."""
    M, K = x.shape
    N = w.shape[1]
    tm, Mp = _tile(M, TM)
    tk, Kp = _tile(K, TK)
    tn, Np = _tile(N, TN)
    xp = _pad2(x, Mp, Kp)
    wp = _pad2(w, Kp, Np)
    bp = jnp.pad(b, (0, Np - N)).reshape(1, Np)
    out = pl.pallas_call(
        functools.partial(_matmul_kernel, activation=activation),
        out_shape=jax.ShapeDtypeStruct((Mp, Np), out_dtype),
        grid=(Mp // tm, Np // tn, Kp // tk),
        in_specs=[pl.BlockSpec((tm, tk), lambda i, j, k: (i, k)),
                  pl.BlockSpec((tk, tn), lambda i, j, k: (k, j)),
                  pl.BlockSpec((1, tn), lambda i, j, k: (0, j))],
        out_specs=pl.BlockSpec((tm, tn), lambda i, j, k: (i, j)),
        scratch_shapes=[pltpu.VMEM((tm, tn), jnp.float32)],
        compiler_params=pltpu.CompilerParams(
            dimension_semantics=("parallel", "parallel", "arbitrary"),
            vmem_limit_bytes=VMEM_LIMIT),
    )(xp, wp, bp)
    return out[:M, :N]


# -------------- tiled matmul fused with bias + residual + LayerNorm ----------------

def _matmul_res_ln_kernel(x_ref, w_ref, b_ref, r_ref, g_ref, bt_ref,
                          o_ref, acc_ref, *, eps):
    @pl.when(pl.program_id(1) == 0)
    def _():
        acc_ref[...] = jnp.zeros_like(acc_ref)

    acc_ref[...] += jnp.dot(x_ref[...], w_ref[...],
                            preferred_element_type=jnp.float32)

    @pl.when(pl.program_id(1) == pl.num_programs(1) - 1)
    def _():
        y = (acc_ref[...] + b_ref[...].astype(jnp.float32)
             + r_ref[...].astype(jnp.float32))
        mu = jnp.mean(y, axis=-1, keepdims=True)
        var = jnp.mean(jnp.square(y - mu), axis=-1, keepdims=True)
        yn = (y - mu) * jax.lax.rsqrt(var + eps)
        o_ref[...] = (yn * g_ref[...].astype(jnp.float32)
                      + bt_ref[...].astype(jnp.float32)).astype(o_ref.dtype)


def matmul_bias_residual_layernorm(x, w, b, res, gamma, beta, *,
                                   eps=LN_EPS, out_dtype=jnp.bfloat16):
    """LayerNorm(x @ w + b + res) over the last dim (post-LN). N(=E) is kept whole
    (lane-dense, LN needs full rows); M and K are tiled with an f32 accumulator."""
    M, K = x.shape
    N = w.shape[1]
    tm, Mp = _tile(M, TM)
    tk, Kp = _tile(K, TK)
    xp = _pad2(x, Mp, Kp)
    wp = _pad2(w, Kp, N)
    rp = _pad2(res, Mp, N)
    out = pl.pallas_call(
        functools.partial(_matmul_res_ln_kernel, eps=eps),
        out_shape=jax.ShapeDtypeStruct((Mp, N), out_dtype),
        grid=(Mp // tm, Kp // tk),
        in_specs=[pl.BlockSpec((tm, tk), lambda i, k: (i, k)),
                  pl.BlockSpec((tk, N), lambda i, k: (k, 0)),
                  pl.BlockSpec((1, N), lambda i, k: (0, 0)),
                  pl.BlockSpec((tm, N), lambda i, k: (i, 0)),
                  pl.BlockSpec((1, N), lambda i, k: (0, 0)),
                  pl.BlockSpec((1, N), lambda i, k: (0, 0))],
        out_specs=pl.BlockSpec((tm, N), lambda i, k: (i, 0)),
        scratch_shapes=[pltpu.VMEM((tm, N), jnp.float32)],
        compiler_params=pltpu.CompilerParams(
            dimension_semantics=("parallel", "arbitrary"),
            vmem_limit_bytes=VMEM_LIMIT),
    )(xp, wp, b.reshape(1, N), rp, gamma.reshape(1, N), beta.reshape(1, N))
    return out[:M]


# -------------------------------- attention -----------------------------------

def _attn_kernel(qkv_ref, o_ref, *, n_heads, head_dim, scale):
    S = qkv_ref.shape[1]
    E = n_heads * head_dim
    # Causal mask generated in-kernel (no (S,S) mask DMA / VMEM residency).
    row = jax.lax.broadcasted_iota(jnp.int32, (S, S), 0)
    col = jax.lax.broadcasted_iota(jnp.int32, (S, S), 1)
    causal = col <= row
    outs = []
    for h in range(n_heads):                       # static loop over heads
        q = qkv_ref[0, :, h * head_dim:(h + 1) * head_dim]
        k = qkv_ref[0, :, E + h * head_dim:E + (h + 1) * head_dim]
        v = qkv_ref[0, :, 2 * E + h * head_dim:2 * E + (h + 1) * head_dim]
        s = jax.lax.dot_general(q, k, (((1,), (1,)), ((), ())),
                                preferred_element_type=jnp.float32) * scale
        s = jnp.where(causal, s, -1e30)            # diagonal always unmasked
        m = jnp.max(s, axis=-1, keepdims=True)
        p = jnp.exp(s - m)
        denom = jnp.sum(p, axis=-1, keepdims=True)
        p = p * pl.reciprocal(denom, approx=True)
        outs.append(jnp.dot(p.astype(v.dtype), v,
                            preferred_element_type=jnp.float32))
    # Single lane-dense (S, E) store for all heads.
    o_ref[0] = jnp.concatenate(outs, axis=-1).astype(o_ref.dtype)


def attention(qkv, *, n_heads, head_dim):
    """qkv: (B, S, 3E) bf16 in PyTorch in_proj order [q|k|v] -> (B, S, E) bf16."""
    B, S, threeE = qkv.shape
    E = n_heads * head_dim
    scale = 1.0 / math.sqrt(head_dim)
    # TODO(synk): for long sequences switch to a flash-style online-softmax with a
    # KV grid axis; here the full SxS scores per head are assumed to fit VMEM.
    return pl.pallas_call(
        functools.partial(_attn_kernel, n_heads=n_heads,
                          head_dim=head_dim, scale=scale),
        out_shape=jax.ShapeDtypeStruct((B, S, E), jnp.bfloat16),
        grid=(B,),
        in_specs=[pl.BlockSpec((1, S, threeE), lambda b: (b, 0, 0))],
        out_specs=pl.BlockSpec((1, S, E), lambda b: (b, 0, 0)),
        compiler_params=pltpu.CompilerParams(
            dimension_semantics=("parallel",),
            vmem_limit_bytes=VMEM_LIMIT),
    )(qkv)


# ------------------------------ model (glue) -----------------------------------

def make_positional_encoding(max_len, E):
    position = jnp.arange(max_len, dtype=jnp.float32)[:, None]
    div_term = jnp.exp(jnp.arange(0, E, 2, dtype=jnp.float32)
                       * (-math.log(10000.0) / E))
    pe = jnp.zeros((max_len, 1, E), dtype=jnp.float32)
    pe = pe.at[:, 0, 0::2].set(jnp.sin(position * div_term))
    pe = pe.at[:, 0, 1::2].set(jnp.cos(position * div_term))
    return pe


def init_params(key, vocab_size, E, n_layers, hidden):
    keys = jax.random.split(key, 2 + n_layers)
    initrange = 0.1

    def u(k, shape, scale):
        return jax.random.uniform(k, shape, jnp.float32, -scale, scale)

    params = {
        'embedding': u(keys[0], (vocab_size, E), initrange),                 # f32 table
        # final projection stored pre-transposed (E, vocab) in bf16
        'out_w': u(keys[1], (E, vocab_size), initrange).astype(jnp.bfloat16),
        'out_b': jnp.zeros((vocab_size,), jnp.float32),
        'layers': [],
    }
    se = 1.0 / math.sqrt(E)
    sh = 1.0 / math.sqrt(hidden)
    for l in range(n_layers):
        k = jax.random.split(keys[2 + l], 4)
        params['layers'].append({
            # all weights pre-transposed to (in_features, out_features), bf16
            'in_proj_w': u(k[0], (E, 3 * E), se).astype(jnp.bfloat16),
            'in_proj_b': jnp.zeros((3 * E,), jnp.float32),
            'out_proj_w': u(k[1], (E, E), se).astype(jnp.bfloat16),
            'out_proj_b': jnp.zeros((E,), jnp.float32),
            'w1': u(k[2], (E, hidden), se).astype(jnp.bfloat16),
            'b1': jnp.zeros((hidden,), jnp.float32),
            'w2': u(k[3], (hidden, E), sh).astype(jnp.bfloat16),
            'b2': jnp.zeros((E,), jnp.float32),
            'ln1_g': jnp.ones((E,), jnp.float32),
            'ln1_b': jnp.zeros((E,), jnp.float32),
            'ln2_g': jnp.ones((E,), jnp.float32),
            'ln2_b': jnp.zeros((E,), jnp.float32),
        })
    return params


def transformer_forward(params, src, *, n_heads, pe):
    """src: (S, B) int32 token ids -> logits (S, B, vocab) (batch_first=False)."""
    S, B = src.shape
    E = params['embedding'].shape[1]
    Dh = E // n_heads

    # Embedding gather + sqrt(E) scale + positional encoding (dropout = identity
    # in eval mode). Internally batch-first (B, S, E) so every Pallas block is
    # lane-dense over E with no strided / transposed HBM access.
    # TODO(synk): the token-id gather itself stays in XLA (data-dependent gather).
    x = jnp.take(params['embedding'], src.T, axis=0) * math.sqrt(E)      # (B, S, E)
    x = x + pe[:S, 0, :][None, :, :]
    x = x.astype(jnp.bfloat16)

    x2 = x.reshape(B * S, E)
    for lp in params['layers']:
        qkv = matmul_bias(x2, lp['in_proj_w'], lp['in_proj_b'])          # (B*S, 3E)
        ao = attention(qkv.reshape(B, S, 3 * E), n_heads=n_heads, head_dim=Dh)
        # out_proj + residual + LayerNorm1 fused (post-LN)
        x2 = matmul_bias_residual_layernorm(
            ao.reshape(B * S, E), lp['out_proj_w'], lp['out_proj_b'],
            x2, lp['ln1_g'], lp['ln1_b'])
        # FFN: (linear1 + ReLU) then (linear2 + bias + residual + LayerNorm2) fused
        h = matmul_bias(x2, lp['w1'], lp['b1'], activation="relu")
        x2 = matmul_bias_residual_layernorm(
            h, lp['w2'], lp['b2'], x2, lp['ln2_g'], lp['ln2_b'])

    logits = matmul_bias(x2, params['out_w'], params['out_b'],
                         out_dtype=jnp.float32)                          # (B*S, V)
    V = logits.shape[-1]
    return logits.reshape(B, S, V).transpose(1, 0, 2)                    # (S, B, V)


if __name__ == "__main__":
    vocab_size, embedding_dims, n_heads, hidden_dims, n_layers = 32, 32, 4, 64, 2
    S, B = 8, 2

    key = jax.random.PRNGKey(0)
    pkey, dkey = jax.random.split(key)
    params = init_params(pkey, vocab_size, embedding_dims, n_layers, hidden_dims)
    src = jax.random.randint(dkey, (S, B), 0, vocab_size, dtype=jnp.int32)
    pe = make_positional_encoding(5000, embedding_dims)

    fwd = jax.jit(functools.partial(transformer_forward, n_heads=n_heads, pe=pe))
    out = jax.block_until_ready(fwd(params, src))

    assert out.shape == (S, B, vocab_size), out.shape
    assert bool(jnp.all(jnp.isfinite(out)))
    print("KERNEL_OK")
</pallas_src>

<mosaic_0001>
module attributes {stable_mosaic.version = 11 : i64} {
  func.func @_matmul_kernel(%arg0: i32, %arg1: i32, %arg2: i32, %arg3: memref<16x32xbf16, #tpu.memory_space<vmem>>, %arg4: memref<32x96xbf16, #tpu.memory_space<vmem>>, %arg5: memref<1x96xf32, #tpu.memory_space<vmem>>, %arg6: memref<16x96xbf16, #tpu.memory_space<vmem>>, %arg7: memref<16x96xf32, #tpu.memory_space<vmem>>) attributes {dimension_semantics = [#tpu.dimension_semantics<parallel>, #tpu.dimension_semantics<parallel>, #tpu.dimension_semantics<arbitrary>], iteration_bounds = array<i64: 1, 1, 1>, scalar_prefetch = 0 : i64, scratch_operands = 1 : i64, tpu.core_type = #tpu.core_type<tc>, window_params = [{transform_indices = @transform_0, window_bounds = array<i64: 16, 32>}, {transform_indices = @transform_1, window_bounds = array<i64: 32, 96>}, {transform_indices = @transform_2, window_bounds = array<i64: 1, 96>}, {transform_indices = @transform_3, window_bounds = array<i64: 16, 96>}]} {
    %c0_i32 = arith.constant 0 : i32
    %0 = arith.cmpi eq, %arg2, %c0_i32 : i32
    %1 = arith.extui %0 : i1 to i32
    %c0_i32_0 = arith.constant 0 : i32
    %2 = arith.cmpi ne, %1, %c0_i32_0 : i32
    scf.if %2 {
      %cst_10 = arith.constant 0.000000e+00 : f32
      %12 = vector.broadcast %cst_10 : f32 to vector<16x96xf32>
      %c0_11 = arith.constant 0 : index
      %c0_12 = arith.constant 0 : index
      %13 = vector.load %arg7[%c0_11, %c0_12] : memref<16x96xf32, #tpu.memory_space<vmem>>, vector<16x96xf32>
      tpu.vector_store %arg7[%c0_11, %c0_12], %12 {strides = array<i32>} : memref<16x96xf32, #tpu.memory_space<vmem>>, vector<16x96xf32>,
    } else {
    }
    %c0 = arith.constant 0 : index
    %c0_1 = arith.constant 0 : index
    %3 = vector.load %arg7[%c0, %c0_1] : memref<16x96xf32, #tpu.memory_space<vmem>>, vector<16x96xf32>
    %c0_2 = arith.constant 0 : index
    %c0_3 = arith.constant 0 : index
    %4 = vector.load %arg3[%c0_2, %c0_3] : memref<16x32xbf16, #tpu.memory_space<vmem>>, vector<16x32xbf16>
    %c0_4 = arith.constant 0 : index
    %c0_5 = arith.constant 0 : index
    %5 = vector.load %arg4[%c0_4, %c0_5] : memref<32x96xbf16, #tpu.memory_space<vmem>>, vector<32x96xbf16>
    %cst = arith.constant dense<0.000000e+00> : vector<16x96xf32>
    %6 = tpu.matmul %4, %5, %cst {dimension_numbers = #tpu.dot_dimension_numbers<[1], [0], [0], [1], [0, 0, 1, 1], [], []>} : vector<16x32xbf16>, vector<32x96xbf16>, vector<16x96xf32> -> vector<16x96xf32>
    %7 = arith.addf %3, %6 : vector<16x96xf32>
    %c0_6 = arith.constant 0 : index
    %c0_7 = arith.constant 0 : index
    %8 = vector.load %arg7[%c0_6, %c0_7] : memref<16x96xf32, #tpu.memory_space<vmem>>, vector<16x96xf32>
    tpu.vector_store %arg7[%c0_6, %c0_7], %7 {strides = array<i32>} : memref<16x96xf32, #tpu.memory_space<vmem>>, vector<16x96xf32>,
    %c0_i32_8 = arith.constant 0 : i32
    %9 = arith.cmpi eq, %arg2, %c0_i32_8 : i32
    %10 = arith.extui %9 : i1 to i32
    %c0_i32_9 = arith.constant 0 : i32
    %11 = arith.cmpi ne, %10, %c0_i32_9 : i32
    scf.if %11 {
      %c0_10 = arith.constant 0 : index
      %c0_11 = arith.constant 0 : index
      %12 = vector.load %arg7[%c0_10, %c0_11] : memref<16x96xf32, #tpu.memory_space<vmem>>, vector<16x96xf32>
      %c0_12 = arith.constant 0 : index
      %c0_13 = arith.constant 0 : index
      %13 = vector.load %arg5[%c0_12, %c0_13] : memref<1x96xf32, #tpu.memory_space<vmem>>, vector<1x96xf32>
      %14 = vector.broadcast %13 : vector<1x96xf32> to vector<16x96xf32>
      %15 = arith.addf %12, %14 : vector<16x96xf32>
      %16 = arith.truncf %15 : vector<16x96xf32> to vector<16x96xbf16>
      %c0_14 = arith.constant 0 : index
      %c0_15 = arith.constant 0 : index
      %17 = vector.load %arg6[%c0_14, %c0_15] : memref<16x96xbf16, #tpu.memory_space<vmem>>, vector<16x96xbf16>
      tpu.vector_store %arg6[%c0_14, %c0_15], %16 {strides = array<i32>} : memref<16x96xbf16, #tpu.memory_space<vmem>>, vector<16x96xbf16>,
    } else {
    }
    return
  }
  func.func @transform_0(%arg0: i32, %arg1: i32, %arg2: i32) -> (i32, i32) {
    %c0_i32 = arith.constant 0 : i32
    return %arg0, %arg2 : i32, i32
  }
  func.func @transform_1(%arg0: i32, %arg1: i32, %arg2: i32) -> (i32, i32) {
    %c0_i32 = arith.constant 0 : i32
    return %arg2, %arg1 : i32, i32
  }
  func.func @transform_2(%arg0: i32, %arg1: i32, %arg2: i32) -> (i32, i32) {
    %c0_i32 = arith.constant 0 : i32
    %c0_i32_0 = arith.constant 0 : i32
    return %c0_i32, %arg1 : i32, i32
  }
  func.func @transform_3(%arg0: i32, %arg1: i32, %arg2: i32) -> (i32, i32) {
    %c0_i32 = arith.constant 0 : i32
    return %arg0, %arg1 : i32, i32
  }
}

module attributes {stable_mosaic.version = 11 : i64} {
  func.func @_attn_kernel(%arg0: i32, %arg1: memref<1x8x96xbf16, #tpu.memory_space<vmem>>, %arg2: memref<1x8x32xbf16, #tpu.memory_space<vmem>>) attributes {dimension_semantics = [#tpu.dimension_semantics<parallel>], iteration_bounds = array<i64: 2>, scalar_prefetch = 0 : i64, scratch_operands = 0 : i64, tpu.core_type = #tpu.core_type<tc>, window_params = [{transform_indices = @transform_0, window_bounds = array<i64: 1, 8, 96>}, {transform_indices = @transform_1, window_bounds = array<i64: 1, 8, 32>}]} {
    %0 = tpu.iota {dimensions = array<i32: 0>} : vector<8x8xi32>
    %1 = tpu.iota {dimensions = array<i32: 1>} : vector<8x8xi32>
    %2 = arith.cmpi sle, %1, %0 : vector<8x8xi32>
    %c0 = arith.constant 0 : index
    %c0_0 = arith.constant 0 : index
    %c0_1 = arith.constant 0 : index
    %3 = vector.load %arg1[%c0, %c0_0, %c0_1] : memref<1x8x96xbf16, #tpu.memory_space<vmem>>, vector<1x8x8xbf16>
    %4 = vector.shape_cast %3 : vector<1x8x8xbf16> to vector<8x8xbf16>
    %c0_2 = arith.constant 0 : index
    %c0_3 = arith.constant 0 : index
    %c32 = arith.constant 32 : index
    %5 = vector.load %arg1[%c0_2, %c0_3, %c32] : memref<1x8x96xbf16, #tpu.memory_space<vmem>>, vector<1x8x8xbf16>
    %6 = vector.shape_cast %5 : vector<1x8x8xbf16> to vector<8x8xbf16>
    %c0_4 = arith.constant 0 : index
    %c0_5 = arith.constant 0 : index
    %c64 = arith.constant 64 : index
    %7 = vector.load %arg1[%c0_4, %c0_5, %c64] : memref<1x8x96xbf16, #tpu.memory_space<vmem>>, vector<1x8x8xbf16>
    %8 = vector.shape_cast %7 : vector<1x8x8xbf16> to vector<8x8xbf16>
    %cst = arith.constant dense<0.000000e+00> : vector<8x8xf32>
    %9 = tpu.matmul %4, %6, %cst {dimension_numbers = #tpu.dot_dimension_numbers<[1], [1], [0], [0], [0, 0, 1, 0], [], []>} : vector<8x8xbf16>, vector<8x8xbf16>, vector<8x8xf32> -> vector<8x8xf32>
    %cst_6 = arith.constant 0.353553385 : f32
    %10 = vector.broadcast %cst_6 : f32 to vector<8x8xf32>
    %11 = arith.mulf %9, %10 : vector<8x8xf32>
    %cst_7 = arith.constant -1.000000e+30 : f32
    %12 = vector.broadcast %cst_7 : f32 to vector<8x8xf32>
    %13 = arith.select %2, %11, %12 : vector<8x8xi1>, vector<8x8xf32>
    %cst_8 = arith.constant dense<0xFF800000> : vector<8xf32>
    %14 = vector.multi_reduction <maximumf>, %13, %cst_8 [1] : vector<8x8xf32> to vector<8xf32>
    %15 = vector.shape_cast %14 : vector<8xf32> to vector<8x1xf32>
    %16 = vector.broadcast %15 : vector<8x1xf32> to vector<8x8xf32>
    %17 = arith.subf %13, %16 : vector<8x8xf32>
    %18 = math.exp %17 : vector<8x8xf32>
    %cst_9 = arith.constant dense<0.000000e+00> : vector<8xf32>
    %19 = vector.multi_reduction <add>, %18, %cst_9 [1] : vector<8x8xf32> to vector<8xf32>
    %20 = vector.shape_cast %19 : vector<8xf32> to vector<8x1xf32>
    %21 = tpu.reciprocal %20 {approx = true} : vector<8x1xf32> -> vector<8x1xf32>
    %22 = vector.broadcast %21 : vector<8x1xf32> to vector<8x8xf32>
    %23 = arith.mulf %18, %22 : vector<8x8xf32>
    %24 = arith.truncf %23 : vector<8x8xf32> to vector<8x8xbf16>
    %cst_10 = arith.constant dense<0.000000e+00> : vector<8x8xf32>
    %25 = tpu.matmul %24, %8, %cst_10 {dimension_numbers = #tpu.dot_dimension_numbers<[1], [0], [0], [1], [0, 0, 1, 1], [], []>} : vector<8x8xbf16>, vector<8x8xbf16>, vector<8x8xf32> -> vector<8x8xf32>
    %c0_11 = arith.constant 0 : index
    %c0_12 = arith.constant 0 : index
    %c8 = arith.constant 8 : index
    %26 = vector.load %arg1[%c0_11, %c0_12, %c8] : memref<1x8x96xbf16, #tpu.memory_space<vmem>>, vector<1x8x8xbf16>
    %27 = vector.shape_cast %26 : vector<1x8x8xbf16> to vector<8x8xbf16>
    %c0_13 = arith.constant 0 : index
    %c0_14 = arith.constant 0 : index
    %c40 = arith.constant 40 : index
    %28 = vector.load %arg1[%c0_13, %c0_14, %c40] : memref<1x8x96xbf16, #tpu.memory_space<vmem>>, vector<1x8x8xbf16>
    %29 = vector.shape_cast %28 : vector<1x8x8xbf16> to vector<8x8xbf16>
    %c0_15 = arith.constant 0 : index
    %c0_16 = arith.constant 0 : index
    %c72 = arith.constant 72 : index
    %30 = vector.load %arg1[%c0_15, %c0_16, %c72] : memref<1x8x96xbf16, #tpu.memory_space<vmem>>, vector<1x8x8xbf16>
    %31 = vector.shape_cast %30 : vector<1x8x8xbf16> to vector<8x8xbf16>
    %cst_17 = arith.constant dense<0.000000e+00> : vector<8x8xf32>
    %32 = tpu.matmul %27, %29, %cst_17 {dimension_numbers = #tpu.dot_dimension_numbers<[1], [1], [0], [0], [0, 0, 1, 0], [], []>} : vector<8x8xbf16>, vector<8x8xbf16>, vector<8x8xf32> -> vector<8x8xf32>
    %cst_18 = arith.constant 0.353553385 : f32
    %33 = vector.broadcast %cst_18 : f32 to vector<8x8xf32>
    %34 = arith.mulf %32, %33 : vector<8x8xf32>
    %cst_19 = arith.constant -1.000000e+30 : f32
    %35 = vector.broadcast %cst_19 : f32 to vector<8x8xf32>
    %36 = arith.select %2, %34, %35 : vector<8x8xi1>, vector<8x8xf32>
    %cst_20 = arith.constant dense<0xFF800000> : vector<8xf32>
    %37 = vector.multi_reduction <maximumf>, %36, %cst_20 [1] : vector<8x8xf32> to vector<8xf32>
    %38 = vector.shape_cast %37 : vector<8xf32> to vector<8x1xf32>
    %39 = vector.broadcast %38 : vector<8x1xf32> to vector<8x8xf32>
    %40 = arith.subf %36, %39 : vector<8x8xf32>
    %41 = math.exp %40 : vector<8x8xf32>
    %cst_21 = arith.constant dense<0.000000e+00> : vector<8xf32>
    %42 = vector.multi_reduction <add>, %41, %cst_21 [1] : vector<8x8xf32> to vector<8xf32>
    %43 = vector.shape_cast %42 : vector<8xf32> to vector<8x1xf32>
    %44 = tpu.reciprocal %43 {approx = true} : vector<8x1xf32> -> vector<8x1xf32>
    %45 = vector.broadcast %44 : vector<8x1xf32> to vector<8x8xf32>
    %46 = arith.mulf %41, %45 : vector<8x8xf32>
    %47 = arith.truncf %46 : vector<8x8xf32> to vector<8x8xbf16>
    %cst_22 = arith.constant dense<0.000000e+00> : vector<8x8xf32>
    %48 = tpu.matmul %47, %31, %cst_22 {dimension_numbers = #tpu.dot_dimension_numbers<[1], [0], [0], [1], [0, 0, 1, 1], [], []>} : vector<8x8xbf16>, vector<8x8xbf16>, vector<8x8xf32> -> vector<8x8xf32>
    %c0_23 = arith.constant 0 : index
    %c0_24 = arith.constant 0 : index
    %c16 = arith.constant 16 : index
    %49 = vector.load %arg1[%c0_23, %c0_24, %c16] : memref<1x8x96xbf16, #tpu.memory_space<vmem>>, vector<1x8x8xbf16>
    %50 = vector.shape_cast %49 : vector<1x8x8xbf16> to vector<8x8xbf16>
    %c0_25 = arith.constant 0 : index
    %c0_26 = arith.constant 0 : index
    %c48 = arith.constant 48 : index
    %51 = vector.load %arg1[%c0_25, %c0_26, %c48] : memref<1x8x96xbf16, #tpu.memory_space<vmem>>, vector<1x8x8xbf16>
    %52 = vector.shape_cast %51 : vector<1x8x8xbf16> to vector<8x8xbf16>
    %c0_27 = arith.constant 0 : index
    %c0_28 = arith.constant 0 : index
    %c80 = arith.constant 80 : index
    %53 = vector.load %arg1[%c0_27, %c0_28, %c80] : memref<1x8x96xbf16, #tpu.memory_space<vmem>>, vector<1x8x8xbf16>
    %54 = vector.shape_cast %53 : vector<1x8x8xbf16> to vector<8x8xbf16>
    %cst_29 = arith.constant dense<0.000000e+00> : vector<8x8xf32>
    %55 = tpu.matmul %50, %52, %cst_29 {dimension_numbers = #tpu.dot_dimension_numbers<[1], [1], [0], [0], [0, 0, 1, 0], [], []>} : vector<8x8xbf16>, vector<8x8xbf16>, vector<8x8xf32> -> vector<8x8xf32>
    %cst_30 = arith.constant 0.353553385 : f32
    %56 = vector.broadcast %cst_30 : f32 to vector<8x8xf32>
    %57 = arith.mulf %55, %56 : vector<8x8xf32>
    %cst_31 = arith.constant -1.000000e+30 : f32
    %58 = vector.broadcast %cst_31 : f32 to vector<8x8xf32>
    %59 = arith.select %2, %57, %58 : vector<8x8xi1>, vector<8x8xf32>
    %cst_32 = arith.constant dense<0xFF800000> : vector<8xf32>
    %60 = vector.multi_reduction <maximumf>, %59, %cst_32 [1] : vector<8x8xf32> to vector<8xf32>
    %61 = vector.shape_cast %60 : vector<8xf32> to vector<8x1xf32>
    %62 = vector.broadcast %61 : vector<8x1xf32> to vector<8x8xf32>
    %63 = arith.subf %59, %62 : vector<8x8xf32>
    %64 = math.exp %63 : vector<8x8xf32>
    %cst_33 = arith.constant dense<0.000000e+00> : vector<8xf32>
    %65 = vector.multi_reduction <add>, %64, %cst_33 [1] : vector<8x8xf32> to vector<8xf32>
    %66 = vector.shape_cast %65 : vector<8xf32> to vector<8x1xf32>
    %67 = tpu.reciprocal %66 {approx = true} : vector<8x1xf32> -> vector<8x1xf32>
    %68 = vector.broadcast %67 : vector<8x1xf32> to vector<8x8xf32>
    %69 = arith.mulf %64, %68 : vector<8x8xf32>
    %70 = arith.truncf %69 : vector<8x8xf32> to vector<8x8xbf16>
    %cst_34 = arith.constant dense<0.000000e+00> : vector<8x8xf32>
    %71 = tpu.matmul %70, %54, %cst_34 {dimension_numbers = #tpu.dot_dimension_numbers<[1], [0], [0], [1], [0, 0, 1, 1], [], []>} : vector<8x8xbf16>, vector<8x8xbf16>, vector<8x8xf32> -> vector<8x8xf32>
    %c0_35 = arith.constant 0 : index
    %c0_36 = arith.constant 0 : index
    %c24 = arith.constant 24 : index
    %72 = vector.load %arg1[%c0_35, %c0_36, %c24] : memref<1x8x96xbf16, #tpu.memory_space<vmem>>, vector<1x8x8xbf16>
    %73 = vector.shape_cast %72 : vector<1x8x8xbf16> to vector<8x8xbf16>
    %c0_37 = arith.constant 0 : index
    %c0_38 = arith.constant 0 : index
    %c56 = arith.constant 56 : index
    %74 = vector.load %arg1[%c0_37, %c0_38, %c56] : memref<1x8x96xbf16, #tpu.memory_space<vmem>>, vector<1x8x8xbf16>
    %75 = vector.shape_cast %74 : vector<1x8x8xbf16> to vector<8x8xbf16>
    %c0_39 = arith.constant 0 : index
    %c0_40 = arith.constant 0 : index
    %c88 = arith.constant 88 : index
    %76 = vector.load %arg1[%c0_39, %c0_40, %c88] : memref<1x8x96xbf16, #tpu.memory_space<vmem>>, vector<1x8x8xbf16>
    %77 = vector.shape_cast %76 : vector<1x8x8xbf16> to vector<8x8xbf16>
    %cst_41 = arith.constant dense<0.000000e+00> : vector<8x8xf32>
    %78 = tpu.matmul %73, %75, %cst_41 {dimension_numbers = #tpu.dot_dimension_numbers<[1], [1], [0], [0], [0, 0, 1, 0], [], []>} : vector<8x8xbf16>, vector<8x8xbf16>, vector<8x8xf32> -> vector<8x8xf32>
    %cst_42 = arith.constant 0.353553385 : f32
    %79 = vector.broadcast %cst_42 : f32 to vector<8x8xf32>
    %80 = arith.mulf %78, %79 : vector<8x8xf32>
    %cst_43 = arith.constant -1.000000e+30 : f32
    %81 = vector.broadcast %cst_43 : f32 to vector<8x8xf32>
    %82 = arith.select %2, %80, %81 : vector<8x8xi1>, vector<8x8xf32>
    %cst_44 = arith.constant dense<0xFF800000> : vector<8xf32>
    %83 = vector.multi_reduction <maximumf>, %82, %cst_44 [1] : vector<8x8xf32> to vector<8xf32>
    %84 = vector.shape_cast %83 : vector<8xf32> to vector<8x1xf32>
    %85 = vector.broadcast %84 : vector<8x1xf32> to vector<8x8xf32>
    %86 = arith.subf %82, %85 : vector<8x8xf32>
    %87 = math.exp %86 : vector<8x8xf32>
    %cst_45 = arith.constant dense<0.000000e+00> : vector<8xf32>
    %88 = vector.multi_reduction <add>, %87, %cst_45 [1] : vector<8x8xf32> to vector<8xf32>
    %89 = vector.shape_cast %88 : vector<8xf32> to vector<8x1xf32>
    %90 = tpu.reciprocal %89 {approx = true} : vector<8x1xf32> -> vector<8x1xf32>
    %91 = vector.broadcast %90 : vector<8x1xf32> to vector<8x8xf32>
    %92 = arith.mulf %87, %91 : vector<8x8xf32>
    %93 = arith.truncf %92 : vector<8x8xf32> to vector<8x8xbf16>
    %cst_46 = arith.constant dense<0.000000e+00> : vector<8x8xf32>
    %94 = tpu.matmul %93, %77, %cst_46 {dimension_numbers = #tpu.dot_dimension_numbers<[1], [0], [0], [1], [0, 0, 1, 1], [], []>} : vector<8x8xbf16>, vector<8x8xbf16>, vector<8x8xf32> -> vector<8x8xf32>
    %95 = tpu.concatenate %25, %48, %71, %94 in 1 : vector<8x8xf32>, vector<8x8xf32>, vector<8x8xf32>, vector<8x8xf32> -> vector<8x32xf32>
    %96 = arith.truncf %95 : vector<8x32xf32> to vector<8x32xbf16>
    %c0_47 = arith.constant 0 : index
    %c0_48 = arith.constant 0 : index
    %c0_49 = arith.constant 0 : index
    %97 = vector.load %arg2[%c0_47, %c0_48, %c0_49] : memref<1x8x32xbf16, #tpu.memory_space<vmem>>, vector<1x8x32xbf16>
    %98 = vector.shape_cast %97 : vector<1x8x32xbf16> to vector<8x32xbf16>
    %99 = vector.shape_cast %96 : vector<8x32xbf16> to vector<1x8x32xbf16>
    tpu.vector_store %arg2[%c0_47, %c0_48, %c0_49], %99 {strides = array<i32>} : memref<1x8x32xbf16, #tpu.memory_space<vmem>>, vector<1x8x32xbf16>,
    return
  }
  func.func @transform_0(%arg0: i32) -> (i32, i32, i32) {
    %c0_i32 = arith.constant 0 : i32
    %c0_i32_0 = arith.constant 0 : i32
    %c0_i32_1 = arith.constant 0 : i32
    return %arg0, %c0_i32, %c0_i32_0 : i32, i32, i32
  }
  func.func @transform_1(%arg0: i32) -> (i32, i32, i32) {
    %c0_i32 = arith.constant 0 : i32
    %c0_i32_0 = arith.constant 0 : i32
    %c0_i32_1 = arith.constant 0 : i32
    return %arg0, %c0_i32, %c0_i32_0 : i32, i32, i32
  }
}

module attributes {stable_mosaic.version = 11 : i64} {
  func.func @_matmul_res_ln_kernel(%arg0: i32, %arg1: i32, %arg2: memref<16x32xbf16, #tpu.memory_space<vmem>>, %arg3: memref<32x32xbf16, #tpu.memory_space<vmem>>, %arg4: memref<1x32xf32, #tpu.memory_space<vmem>>, %arg5: memref<16x32xbf16, #tpu.memory_space<vmem>>, %arg6: memref<1x32xf32, #tpu.memory_space<vmem>>, %arg7: memref<1x32xf32, #tpu.memory_space<vmem>>, %arg8: memref<16x32xbf16, #tpu.memory_space<vmem>>, %arg9: memref<16x32xf32, #tpu.memory_space<vmem>>) attributes {dimension_semantics = [#tpu.dimension_semantics<parallel>, #tpu.dimension_semantics<arbitrary>], iteration_bounds = array<i64: 1, 1>, scalar_prefetch = 0 : i64, scratch_operands = 1 : i64, tpu.core_type = #tpu.core_type<tc>, window_params = [{transform_indices = @transform_0, window_bounds = array<i64: 16, 32>}, {transform_indices = @transform_1, window_bounds = array<i64: 32, 32>}, {pipeline_mode = #tpu.pipeline_mode<synchronous>, transform_indices = @transform_2, window_bounds = array<i64: 1, 32>}, {transform_indices = @transform_3, window_bounds = array<i64: 16, 32>}, {pipeline_mode = #tpu.pipeline_mode<synchronous>, transform_indices = @transform_4, window_bounds = array<i64: 1, 32>}, {pipeline_mode = #tpu.pipeline_mode<synchronous>, transform_indices = @transform_5, window_bounds = array<i64: 1, 32>}, {transform_indices = @transform_6, window_bounds = array<i64: 16, 32>}]} {
    %c0_i32 = arith.constant 0 : i32
    %0 = arith.cmpi eq, %arg1, %c0_i32 : i32
    %1 = arith.extui %0 : i1 to i32
    %c0_i32_0 = arith.constant 0 : i32
    %2 = arith.cmpi ne, %1, %c0_i32_0 : i32
    scf.if %2 {
      %cst_10 = arith.constant 0.000000e+00 : f32
      %12 = vector.broadcast %cst_10 : f32 to vector<16x32xf32>
      %c0_11 = arith.constant 0 : index
      %c0_12 = arith.constant 0 : index
      %13 = vector.load %arg9[%c0_11, %c0_12] : memref<16x32xf32, #tpu.memory_space<vmem>>, vector<16x32xf32>
      tpu.vector_store %arg9[%c0_11, %c0_12], %12 {strides = array<i32>} : memref<16x32xf32, #tpu.memory_space<vmem>>, vector<16x32xf32>,
    } else {
    }
    %c0 = arith.constant 0 : index
    %c0_1 = arith.constant 0 : index
    %3 = vector.load %arg9[%c0, %c0_1] : memref<16x32xf32, #tpu.memory_space<vmem>>, vector<16x32xf32>
    %c0_2 = arith.constant 0 : index
    %c0_3 = arith.constant 0 : index
    %4 = vector.load %arg2[%c0_2, %c0_3] : memref<16x32xbf16, #tpu.memory_space<vmem>>, vector<16x32xbf16>
    %c0_4 = arith.constant 0 : index
    %c0_5 = arith.constant 0 : index
    %5 = vector.load %arg3[%c0_4, %c0_5] : memref<32x32xbf16, #tpu.memory_space<vmem>>, vector<32x32xbf16>
    %cst = arith.constant dense<0.000000e+00> : vector<16x32xf32>
    %6 = tpu.matmul %4, %5, %cst {dimension_numbers = #tpu.dot_dimension_numbers<[1], [0], [0], [1], [0, 0, 1, 1], [], []>} : vector<16x32xbf16>, vector<32x32xbf16>, vector<16x32xf32> -> vector<16x32xf32>
    %7 = arith.addf %3, %6 : vector<16x32xf32>
    %c0_6 = arith.constant 0 : index
    %c0_7 = arith.constant 0 : index
    %8 = vector.load %arg9[%c0_6, %c0_7] : memref<16x32xf32, #tpu.memory_space<vmem>>, vector<16x32xf32>
    tpu.vector_store %arg9[%c0_6, %c0_7], %7 {strides = array<i32>} : memref<16x32xf32, #tpu.memory_space<vmem>>, vector<16x32xf32>,
    %c0_i32_8 = arith.constant 0 : i32
    %9 = arith.cmpi eq, %arg1, %c0_i32_8 : i32
    %10 = arith.extui %9 : i1 to i32
    %c0_i32_9 = arith.constant 0 : i32
    %11 = arith.cmpi ne, %10, %c0_i32_9 : i32
    scf.if %11 {
      %c0_10 = arith.constant 0 : index
      %c0_11 = arith.constant 0 : index
      %12 = vector.load %arg9[%c0_10, %c0_11] : memref<16x32xf32, #tpu.memory_space<vmem>>, vector<16x32xf32>
      %c0_12 = arith.constant 0 : index
      %c0_13 = arith.constant 0 : index
      %13 = vector.load %arg4[%c0_12, %c0_13] : memref<1x32xf32, #tpu.memory_space<vmem>>, vector<1x32xf32>
      %14 = vector.broadcast %13 : vector<1x32xf32> to vector<16x32xf32>
      %15 = arith.addf %12, %14 : vector<16x32xf32>
      %c0_14 = arith.constant 0 : index
      %c0_15 = arith.constant 0 : index
      %16 = vector.load %arg5[%c0_14, %c0_15] : memref<16x32xbf16, #tpu.memory_space<vmem>>, vector<16x32xbf16>
      %17 = arith.extf %16 : vector<16x32xbf16> to vector<16x32xf32>
      %18 = arith.addf %15, %17 : vector<16x32xf32>
      %cst_16 = arith.constant dense<0.000000e+00> : vector<16xf32>
      %19 = vector.multi_reduction <add>, %18, %cst_16 [1] : vector<16x32xf32> to vector<16xf32>
      %20 = vector.shape_cast %19 : vector<16xf32> to vector<16x1xf32>
      %cst_17 = arith.constant 3.200000e+01 : f32
      %21 = vector.broadcast %cst_17 : f32 to vector<16x1xf32>
      %22 = arith.divf %20, %21 : vector<16x1xf32>
      %23 = vector.broadcast %22 : vector<16x1xf32> to vector<16x32xf32>
      %24 = arith.subf %18, %23 : vector<16x32xf32>
      %25 = arith.mulf %24, %24 : vector<16x32xf32>
      %cst_18 = arith.constant dense<0.000000e+00> : vector<16xf32>
      %26 = vector.multi_reduction <add>, %25, %cst_18 [1] : vector<16x32xf32> to vector<16xf32>
      %27 = vector.shape_cast %26 : vector<16xf32> to vector<16x1xf32>
      %cst_19 = arith.constant 3.200000e+01 : f32
      %28 = vector.broadcast %cst_19 : f32 to vector<16x1xf32>
      %29 = arith.divf %27, %28 : vector<16x1xf32>
      %30 = vector.broadcast %22 : vector<16x1xf32> to vector<16x32xf32>
      %31 = arith.subf %18, %30 : vector<16x32xf32>
      %cst_20 = arith.constant 9.99999974E-6 : f32
      %32 = vector.broadcast %cst_20 : f32 to vector<16x1xf32>
      %33 = arith.addf %29, %32 : vector<16x1xf32>
      %34 = math.rsqrt %33 : vector<16x1xf32>
      %35 = vector.broadcast %34 : vector<16x1xf32> to vector<16x32xf32>
      %36 = arith.mulf %31, %35 : vector<16x32xf32>
      %c0_21 = arith.constant 0 : index
      %c0_22 = arith.constant 0 : index
      %37 = vector.load %arg6[%c0_21, %c0_22] : memref<1x32xf32, #tpu.memory_space<vmem>>, vector<1x32xf32>
      %38 = vector.broadcast %37 : vector<1x32xf32> to vector<16x32xf32>
      %39 = arith.mulf %36, %38 : vector<16x32xf32>
      %c0_23 = arith.constant 0 : index
      %c0_24 = arith.constant 0 : index
      %40 = vector.load %arg7[%c0_23, %c0_24] : memref<1x32xf32, #tpu.memory_space<vmem>>, vector<1x32xf32>
      %41 = vector.broadcast %40 : vector<1x32xf32> to vector<16x32xf32>
      %42 = arith.addf %39, %41 : vector<16x32xf32>
      %43 = arith.truncf %42 : vector<16x32xf32> to vector<16x32xbf16>
      %c0_25 = arith.constant 0 : index
      %c0_26 = arith.constant 0 : index
      %44 = vector.load %arg8[%c0_25, %c0_26] : memref<16x32xbf16, #tpu.memory_space<vmem>>, vector<16x32xbf16>
      tpu.vector_store %arg8[%c0_25, %c0_26], %43 {strides = array<i32>} : memref<16x32xbf16, #tpu.memory_space<vmem>>, vector<16x32xbf16>,
    } else {
    }
    return
  }
  func.func @transform_0(%arg0: i32, %arg1: i32) -> (i32, i32) {
    %c0_i32 = arith.constant 0 : i32
    return %arg0, %arg1 : i32, i32
  }
  func.func @transform_1(%arg0: i32, %arg1: i32) -> (i32, i32) {
    %c0_i32 = arith.constant 0 : i32
    %c0_i32_0 = arith.constant 0 : i32
    return %arg1, %c0_i32 : i32, i32
  }
  func.func @transform_2(%arg0: i32, %arg1: i32) -> (i32, i32) {
    %c0_i32 = arith.constant 0 : i32
    %c0_i32_0 = arith.constant 0 : i32
    %c0_i32_1 = arith.constant 0 : i32
    return %c0_i32, %c0_i32_0 : i32, i32
  }
  func.func @transform_3(%arg0: i32, %arg1: i32) -> (i32, i32) {
    %c0_i32 = arith.constant 0 : i32
    %c0_i32_0 = arith.constant 0 : i32
    return %arg0, %c0_i32 : i32, i32
  }
  func.func @transform_4(%arg0: i32, %arg1: i32) -> (i32, i32) {
    %c0_i32 = arith.constant 0 : i32
    %c0_i32_0 = arith.constant 0 : i32
    %c0_i32_1 = arith.constant 0 : i32
    return %c0_i32, %c0_i32_0 : i32, i32
  }
  func.func @transform_5(%arg0: i32, %arg1: i32) -> (i32, i32) {
    %c0_i32 = arith.constant 0 : i32
    %c0_i32_0 = arith.constant 0 : i32
    %c0_i32_1 = arith.constant 0 : i32
    return %c0_i32, %c0_i32_0 : i32, i32
  }
  func.func @transform_6(%arg0: i32, %arg1: i32) -> (i32, i32) {
    %c0_i32 = arith.constant 0 : i32
    %c0_i32_0 = arith.constant 0 : i32
    return %arg0, %c0_i32 : i32, i32
  }
}

module attributes {stable_mosaic.version = 11 : i64} {
  func.func @_matmul_kernel(%arg0: i32, %arg1: i32, %arg2: i32, %arg3: memref<16x32xbf16, #tpu.memory_space<vmem>>, %arg4: memref<32x64xbf16, #tpu.memory_space<vmem>>, %arg5: memref<1x64xf32, #tpu.memory_space<vmem>>, %arg6: memref<16x64xbf16, #tpu.memory_space<vmem>>, %arg7: memref<16x64xf32, #tpu.memory_space<vmem>>) attributes {dimension_semantics = [#tpu.dimension_semantics<parallel>, #tpu.dimension_semantics<parallel>, #tpu.dimension_semantics<arbitrary>], iteration_bounds = array<i64: 1, 1, 1>, scalar_prefetch = 0 : i64, scratch_operands = 1 : i64, tpu.core_type = #tpu.core_type<tc>, window_params = [{transform_indices = @transform_0, window_bounds = array<i64: 16, 32>}, {transform_indices = @transform_1, window_bounds = array<i64: 32, 64>}, {transform_indices = @transform_2, window_bounds = array<i64: 1, 64>}, {transform_indices = @transform_3, window_bounds = array<i64: 16, 64>}]} {
    %c0_i32 = arith.constant 0 : i32
    %0 = arith.cmpi eq, %arg2, %c0_i32 : i32
    %1 = arith.extui %0 : i1 to i32
    %c0_i32_0 = arith.constant 0 : i32
    %2 = arith.cmpi ne, %1, %c0_i32_0 : i32
    scf.if %2 {
      %cst_10 = arith.constant 0.000000e+00 : f32
      %12 = vector.broadcast %cst_10 : f32 to vector<16x64xf32>
      %c0_11 = arith.constant 0 : index
      %c0_12 = arith.constant 0 : index
      %13 = vector.load %arg7[%c0_11, %c0_12] : memref<16x64xf32, #tpu.memory_space<vmem>>, vector<16x64xf32>
      tpu.vector_store %arg7[%c0_11, %c0_12], %12 {strides = array<i32>} : memref<16x64xf32, #tpu.memory_space<vmem>>, vector<16x64xf32>,
    } else {
    }
    %c0 = arith.constant 0 : index
    %c0_1 = arith.constant 0 : index
    %3 = vector.load %arg7[%c0, %c0_1] : memref<16x64xf32, #tpu.memory_space<vmem>>, vector<16x64xf32>
    %c0_2 = arith.constant 0 : index
    %c0_3 = arith.constant 0 : index
    %4 = vector.load %arg3[%c0_2, %c0_3] : memref<16x32xbf16, #tpu.memory_space<vmem>>, vector<16x32xbf16>
    %c0_4 = arith.constant 0 : index
    %c0_5 = arith.constant 0 : index
    %5 = vector.load %arg4[%c0_4, %c0_5] : memref<32x64xbf16, #tpu.memory_space<vmem>>, vector<32x64xbf16>
    %cst = arith.constant dense<0.000000e+00> : vector<16x64xf32>
    %6 = tpu.matmul %4, %5, %cst {dimension_numbers = #tpu.dot_dimension_numbers<[1], [0], [0], [1], [0, 0, 1, 1], [], []>} : vector<16x32xbf16>, vector<32x64xbf16>, vector<16x64xf32> -> vector<16x64xf32>
    %7 = arith.addf %3, %6 : vector<16x64xf32>
    %c0_6 = arith.constant 0 : index
    %c0_7 = arith.constant 0 : index
    %8 = vector.load %arg7[%c0_6, %c0_7] : memref<16x64xf32, #tpu.memory_space<vmem>>, vector<16x64xf32>
    tpu.vector_store %arg7[%c0_6, %c0_7], %7 {strides = array<i32>} : memref<16x64xf32, #tpu.memory_space<vmem>>, vector<16x64xf32>,
    %c0_i32_8 = arith.constant 0 : i32
    %9 = arith.cmpi eq, %arg2, %c0_i32_8 : i32
    %10 = arith.extui %9 : i1 to i32
    %c0_i32_9 = arith.constant 0 : i32
    %11 = arith.cmpi ne, %10, %c0_i32_9 : i32
    scf.if %11 {
      %c0_10 = arith.constant 0 : index
      %c0_11 = arith.constant 0 : index
      %12 = vector.load %arg7[%c0_10, %c0_11] : memref<16x64xf32, #tpu.memory_space<vmem>>, vector<16x64xf32>
      %c0_12 = arith.constant 0 : index
      %c0_13 = arith.constant 0 : index
      %13 = vector.load %arg5[%c0_12, %c0_13] : memref<1x64xf32, #tpu.memory_space<vmem>>, vector<1x64xf32>
      %14 = vector.broadcast %13 : vector<1x64xf32> to vector<16x64xf32>
      %15 = arith.addf %12, %14 : vector<16x64xf32>
      %cst_14 = arith.constant 0.000000e+00 : f32
      %16 = vector.broadcast %cst_14 : f32 to vector<16x64xf32>
      %17 = arith.maximumf %15, %16 : vector<16x64xf32>
      %18 = arith.truncf %17 : vector<16x64xf32> to vector<16x64xbf16>
      %c0_15 = arith.constant 0 : index
      %c0_16 = arith.constant 0 : index
      %19 = vector.load %arg6[%c0_15, %c0_16] : memref<16x64xbf16, #tpu.memory_space<vmem>>, vector<16x64xbf16>
      tpu.vector_store %arg6[%c0_15, %c0_16], %18 {strides = array<i32>} : memref<16x64xbf16, #tpu.memory_space<vmem>>, vector<16x64xbf16>,
    } else {
    }
    return
  }
  func.func @transform_0(%arg0: i32, %arg1: i32, %arg2: i32) -> (i32, i32) {
    %c0_i32 = arith.constant 0 : i32
    return %arg0, %arg2 : i32, i32
  }
  func.func @transform_1(%arg0: i32, %arg1: i32, %arg2: i32) -> (i32, i32) {
    %c0_i32 = arith.constant 0 : i32
    return %arg2, %arg1 : i32, i32
  }
  func.func @transform_2(%arg0: i32, %arg1: i32, %arg2: i32) -> (i32, i32) {
    %c0_i32 = arith.constant 0 : i32
    %c0_i32_0 = arith.constant 0 : i32
    return %c0_i32, %arg1 : i32, i32
  }
  func.func @transform_3(%arg0: i32, %arg1: i32, %arg2: i32) -> (i32, i32) {
    %c0_i32 = arith.constant 0 : i32
    return %arg0, %arg1 : i32, i32
  }
}

module attributes {stable_mosaic.version = 11 : i64} {
  func.func @_matmul_kernel(%arg0: i32, %arg1: i32, %arg2: i32, %arg3: memref<16x32xbf16, #tpu.memory_space<vmem>>, %arg4: memref<32x32xbf16, #tpu.memory_space<vmem>>, %arg5: memref<1x32xf32, #tpu.memory_space<vmem>>, %arg6: memref<16x32xf32, #tpu.memory_space<vmem>>, %arg7: memref<16x32xf32, #tpu.memory_space<vmem>>) attributes {dimension_semantics = [#tpu.dimension_semantics<parallel>, #tpu.dimension_semantics<parallel>, #tpu.dimension_semantics<arbitrary>], iteration_bounds = array<i64: 1, 1, 1>, scalar_prefetch = 0 : i64, scratch_operands = 1 : i64, tpu.core_type = #tpu.core_type<tc>, window_params = [{transform_indices = @transform_0, window_bounds = array<i64: 16, 32>}, {transform_indices = @transform_1, window_bounds = array<i64: 32, 32>}, {transform_indices = @transform_2, window_bounds = array<i64: 1, 32>}, {transform_indices = @transform_3, window_bounds = array<i64: 16, 32>}]} {
    %c0_i32 = arith.constant 0 : i32
    %0 = arith.cmpi eq, %arg2, %c0_i32 : i32
    %1 = arith.extui %0 : i1 to i32
    %c0_i32_0 = arith.constant 0 : i32
    %2 = arith.cmpi ne, %1, %c0_i32_0 : i32
    scf.if %2 {
      %cst_10 = arith.constant 0.000000e+00 : f32
      %12 = vector.broadcast %cst_10 : f32 to vector<16x32xf32>
      %c0_11 = arith.constant 0 : index
      %c0_12 = arith.constant 0 : index
      %13 = vector.load %arg7[%c0_11, %c0_12] : memref<16x32xf32, #tpu.memory_space<vmem>>, vector<16x32xf32>
      tpu.vector_store %arg7[%c0_11, %c0_12], %12 {strides = array<i32>} : memref<16x32xf32, #tpu.memory_space<vmem>>, vector<16x32xf32>,
    } else {
    }
    %c0 = arith.constant 0 : index
    %c0_1 = arith.constant 0 : index
    %3 = vector.load %arg7[%c0, %c0_1] : memref<16x32xf32, #tpu.memory_space<vmem>>, vector<16x32xf32>
    %c0_2 = arith.constant 0 : index
    %c0_3 = arith.constant 0 : index
    %4 = vector.load %arg3[%c0_2, %c0_3] : memref<16x32xbf16, #tpu.memory_space<vmem>>, vector<16x32xbf16>
    %c0_4 = arith.constant 0 : index
    %c0_5 = arith.constant 0 : index
    %5 = vector.load %arg4[%c0_4, %c0_5] : memref<32x32xbf16, #tpu.memory_space<vmem>>, vector<32x32xbf16>
    %cst = arith.constant dense<0.000000e+00> : vector<16x32xf32>
    %6 = tpu.matmul %4, %5, %cst {dimension_numbers = #tpu.dot_dimension_numbers<[1], [0], [0], [1], [0, 0, 1, 1], [], []>} : vector<16x32xbf16>, vector<32x32xbf16>, vector<16x32xf32> -> vector<16x32xf32>
    %7 = arith.addf %3, %6 : vector<16x32xf32>
    %c0_6 = arith.constant 0 : index
    %c0_7 = arith.constant 0 : index
    %8 = vector.load %arg7[%c0_6, %c0_7] : memref<16x32xf32, #tpu.memory_space<vmem>>, vector<16x32xf32>
    tpu.vector_store %arg7[%c0_6, %c0_7], %7 {strides = array<i32>} : memref<16x32xf32, #tpu.memory_space<vmem>>, vector<16x32xf32>,
    %c0_i32_8 = arith.constant 0 : i32
    %9 = arith.cmpi eq, %arg2, %c0_i32_8 : i32
    %10 = arith.extui %9 : i1 to i32
    %c0_i32_9 = arith.constant 0 : i32
    %11 = arith.cmpi ne, %10, %c0_i32_9 : i32
    scf.if %11 {
      %c0_10 = arith.constant 0 : index
      %c0_11 = arith.constant 0 : index
      %12 = vector.load %arg7[%c0_10, %c0_11] : memref<16x32xf32, #tpu.memory_space<vmem>>, vector<16x32xf32>
      %c0_12 = arith.constant 0 : index
      %c0_13 = arith.constant 0 : index
      %13 = vector.load %arg5[%c0_12, %c0_13] : memref<1x32xf32, #tpu.memory_space<vmem>>, vector<1x32xf32>
      %14 = vector.broadcast %13 : vector<1x32xf32> to vector<16x32xf32>
      %15 = arith.addf %12, %14 : vector<16x32xf32>
      %c0_14 = arith.constant 0 : index
      %c0_15 = arith.constant 0 : index
      %16 = vector.load %arg6[%c0_14, %c0_15] : memref<16x32xf32, #tpu.memory_space<vmem>>, vector<16x32xf32>
      tpu.vector_store %arg6[%c0_14, %c0_15], %15 {strides = array<i32>} : memref<16x32xf32, #tpu.memory_space<vmem>>, vector<16x32xf32>,
    } else {
    }
    return
  }
  func.func @transform_0(%arg0: i32, %arg1: i32, %arg2: i32) -> (i32, i32) {
    %c0_i32 = arith.constant 0 : i32
    return %arg0, %arg2 : i32, i32
  }
  func.func @transform_1(%arg0: i32, %arg1: i32, %arg2: i32) -> (i32, i32) {
    %c0_i32 = arith.constant 0 : i32
    return %arg2, %arg1 : i32, i32
  }
  func.func @transform_2(%arg0: i32, %arg1: i32, %arg2: i32) -> (i32, i32) {
    %c0_i32 = arith.constant 0 : i32
    %c0_i32_0 = arith.constant 0 : i32
    return %c0_i32, %arg1 : i32, i32
  }
  func.func @transform_3(%arg0: i32, %arg1: i32, %arg2: i32) -> (i32, i32) {
    %c0_i32 = arith.constant 0 : i32
    return %arg0, %arg1 : i32, i32
  }
}

module attributes {stable_mosaic.version = 11 : i64} {
  func.func @_matmul_res_ln_kernel(%arg0: i32, %arg1: i32, %arg2: memref<16x64xbf16, #tpu.memory_space<vmem>>, %arg3: memref<64x32xbf16, #tpu.memory_space<vmem>>, %arg4: memref<1x32xf32, #tpu.memory_space<vmem>>, %arg5: memref<16x32xbf16, #tpu.memory_space<vmem>>, %arg6: memref<1x32xf32, #tpu.memory_space<vmem>>, %arg7: memref<1x32xf32, #tpu.memory_space<vmem>>, %arg8: memref<16x32xbf16, #tpu.memory_space<vmem>>, %arg9: memref<16x32xf32, #tpu.memory_space<vmem>>) attributes {dimension_semantics = [#tpu.dimension_semantics<parallel>, #tpu.dimension_semantics<arbitrary>], iteration_bounds = array<i64: 1, 1>, scalar_prefetch = 0 : i64, scratch_operands = 1 : i64, tpu.core_type = #tpu.core_type<tc>, window_params = [{transform_indices = @transform_0, window_bounds = array<i64: 16, 64>}, {transform_indices = @transform_1, window_bounds = array<i64: 64, 32>}, {pipeline_mode = #tpu.pipeline_mode<synchronous>, transform_indices = @transform_2, window_bounds = array<i64: 1, 32>}, {transform_indices = @transform_3, window_bounds = array<i64: 16, 32>}, {pipeline_mode = #tpu.pipeline_mode<synchronous>, transform_indices = @transform_4, window_bounds = array<i64: 1, 32>}, {pipeline_mode = #tpu.pipeline_mode<synchronous>, transform_indices = @transform_5, window_bounds = array<i64: 1, 32>}, {transform_indices = @transform_6, window_bounds = array<i64: 16, 32>}]} {
    %c0_i32 = arith.constant 0 : i32
    %0 = arith.cmpi eq, %arg1, %c0_i32 : i32
    %1 = arith.extui %0 : i1 to i32
    %c0_i32_0 = arith.constant 0 : i32
    %2 = arith.cmpi ne, %1, %c0_i32_0 : i32
    scf.if %2 {
      %cst_10 = arith.constant 0.000000e+00 : f32
      %12 = vector.broadcast %cst_10 : f32 to vector<16x32xf32>
      %c0_11 = arith.constant 0 : index
      %c0_12 = arith.constant 0 : index
      %13 = vector.load %arg9[%c0_11, %c0_12] : memref<16x32xf32, #tpu.memory_space<vmem>>, vector<16x32xf32>
      tpu.vector_store %arg9[%c0_11, %c0_12], %12 {strides = array<i32>} : memref<16x32xf32, #tpu.memory_space<vmem>>, vector<16x32xf32>,
    } else {
    }
    %c0 = arith.constant 0 : index
    %c0_1 = arith.constant 0 : index
    %3 = vector.load %arg9[%c0, %c0_1] : memref<16x32xf32, #tpu.memory_space<vmem>>, vector<16x32xf32>
    %c0_2 = arith.constant 0 : index
    %c0_3 = arith.constant 0 : index
    %4 = vector.load %arg2[%c0_2, %c0_3] : memref<16x64xbf16, #tpu.memory_space<vmem>>, vector<16x64xbf16>
    %c0_4 = arith.constant 0 : index
    %c0_5 = arith.constant 0 : index
    %5 = vector.load %arg3[%c0_4, %c0_5] : memref<64x32xbf16, #tpu.memory_space<vmem>>, vector<64x32xbf16>
    %cst = arith.constant dense<0.000000e+00> : vector<16x32xf32>
    %6 = tpu.matmul %4, %5, %cst {dimension_numbers = #tpu.dot_dimension_numbers<[1], [0], [0], [1], [0, 0, 1, 1], [], []>} : vector<16x64xbf16>, vector<64x32xbf16>, vector<16x32xf32> -> vector<16x32xf32>
    %7 = arith.addf %3, %6 : vector<16x32xf32>
    %c0_6 = arith.constant 0 : index
    %c0_7 = arith.constant 0 : index
    %8 = vector.load %arg9[%c0_6, %c0_7] : memref<16x32xf32, #tpu.memory_space<vmem>>, vector<16x32xf32>
    tpu.vector_store %arg9[%c0_6, %c0_7], %7 {strides = array<i32>} : memref<16x32xf32, #tpu.memory_space<vmem>>, vector<16x32xf32>,
    %c0_i32_8 = arith.constant 0 : i32
    %9 = arith.cmpi eq, %arg1, %c0_i32_8 : i32
    %10 = arith.extui %9 : i1 to i32
    %c0_i32_9 = arith.constant 0 : i32
    %11 = arith.cmpi ne, %10, %c0_i32_9 : i32
    scf.if %11 {
      %c0_10 = arith.constant 0 : index
      %c0_11 = arith.constant 0 : index
      %12 = vector.load %arg9[%c0_10, %c0_11] : memref<16x32xf32, #tpu.memory_space<vmem>>, vector<16x32xf32>
      %c0_12 = arith.constant 0 : index
      %c0_13 = arith.constant 0 : index
      %13 = vector.load %arg4[%c0_12, %c0_13] : memref<1x32xf32, #tpu.memory_space<vmem>>, vector<1x32xf32>
      %14 = vector.broadcast %13 : vector<1x32xf32> to vector<16x32xf32>
      %15 = arith.addf %12, %14 : vector<16x32xf32>
      %c0_14 = arith.constant 0 : index
      %c0_15 = arith.constant 0 : index
      %16 = vector.load %arg5[%c0_14, %c0_15] : memref<16x32xbf16, #tpu.memory_space<vmem>>, vector<16x32xbf16>
      %17 = arith.extf %16 : vector<16x32xbf16> to vector<16x32xf32>
      %18 = arith.addf %15, %17 : vector<16x32xf32>
      %cst_16 = arith.constant dense<0.000000e+00> : vector<16xf32>
      %19 = vector.multi_reduction <add>, %18, %cst_16 [1] : vector<16x32xf32> to vector<16xf32>
      %20 = vector.shape_cast %19 : vector<16xf32> to vector<16x1xf32>
      %cst_17 = arith.constant 3.200000e+01 : f32
      %21 = vector.broadcast %cst_17 : f32 to vector<16x1xf32>
      %22 = arith.divf %20, %21 : vector<16x1xf32>
      %23 = vector.broadcast %22 : vector<16x1xf32> to vector<16x32xf32>
      %24 = arith.subf %18, %23 : vector<16x32xf32>
      %25 = arith.mulf %24, %24 : vector<16x32xf32>
      %cst_18 = arith.constant dense<0.000000e+00> : vector<16xf32>
      %26 = vector.multi_reduction <add>, %25, %cst_18 [1] : vector<16x32xf32> to vector<16xf32>
      %27 = vector.shape_cast %26 : vector<16xf32> to vector<16x1xf32>
      %cst_19 = arith.constant 3.200000e+01 : f32
      %28 = vector.broadcast %cst_19 : f32 to vector<16x1xf32>
      %29 = arith.divf %27, %28 : vector<16x1xf32>
      %30 = vector.broadcast %22 : vector<16x1xf32> to vector<16x32xf32>
      %31 = arith.subf %18, %30 : vector<16x32xf32>
      %cst_20 = arith.constant 9.99999974E-6 : f32
      %32 = vector.broadcast %cst_20 : f32 to vector<16x1xf32>
      %33 = arith.addf %29, %32 : vector<16x1xf32>
      %34 = math.rsqrt %33 : vector<16x1xf32>
      %35 = vector.broadcast %34 : vector<16x1xf32> to vector<16x32xf32>
      %36 = arith.mulf %31, %35 : vector<16x32xf32>
      %c0_21 = arith.constant 0 : index
      %c0_22 = arith.constant 0 : index
      %37 = vector.load %arg6[%c0_21, %c0_22] : memref<1x32xf32, #tpu.memory_space<vmem>>, vector<1x32xf32>
      %38 = vector.broadcast %37 : vector<1x32xf32> to vector<16x32xf32>
      %39 = arith.mulf %36, %38 : vector<16x32xf32>
      %c0_23 = arith.constant 0 : index
      %c0_24 = arith.constant 0 : index
      %40 = vector.load %arg7[%c0_23, %c0_24] : memref<1x32xf32, #tpu.memory_space<vmem>>, vector<1x32xf32>
      %41 = vector.broadcast %40 : vector<1x32xf32> to vector<16x32xf32>
      %42 = arith.addf %39, %41 : vector<16x32xf32>
      %43 = arith.truncf %42 : vector<16x32xf32> to vector<16x32xbf16>
      %c0_25 = arith.constant 0 : index
      %c0_26 = arith.constant 0 : index
      %44 = vector.load %arg8[%c0_25, %c0_26] : memref<16x32xbf16, #tpu.memory_space<vmem>>, vector<16x32xbf16>
      tpu.vector_store %arg8[%c0_25, %c0_26], %43 {strides = array<i32>} : memref<16x32xbf16, #tpu.memory_space<vmem>>, vector<16x32xbf16>,
    } else {
    }
    return
  }
  func.func @transform_0(%arg0: i32, %arg1: i32) -> (i32, i32) {
    %c0_i32 = arith.constant 0 : i32
    return %arg0, %arg1 : i32, i32
  }
  func.func @transform_1(%arg0: i32, %arg1: i32) -> (i32, i32) {
    %c0_i32 = arith.constant 0 : i32
    %c0_i32_0 = arith.constant 0 : i32
    return %arg1, %c0_i32 : i32, i32
  }
  func.func @transform_2(%arg0: i32, %arg1: i32) -> (i32, i32) {
    %c0_i32 = arith.constant 0 : i32
    %c0_i32_0 = arith.constant 0 : i32
    %c0_i32_1 = arith.constant 0 : i32
    return %c0_i32, %c0_i32_0 : i32, i32
  }
  func.func @transform_3(%arg0: i32, %arg1: i32) -> (i32, i32) {
    %c0_i32 = arith.constant 0 : i32
    %c0_i32_0 = arith.constant 0 : i32
    return %arg0, %c0_i32 : i32, i32
  }
  func.func @transform_4(%arg0: i32, %arg1: i32) -> (i32, i32) {
    %c0_i32 = arith.constant 0 : i32
    %c0_i32_0 = arith.constant 0 : i32
    %c0_i32_1 = arith.constant 0 : i32
    return %c0_i32, %c0_i32_0 : i32, i32
  }
  func.func @transform_5(%arg0: i32, %arg1: i32) -> (i32, i32) {
    %c0_i32 = arith.constant 0 : i32
    %c0_i32_0 = arith.constant 0 : i32
    %c0_i32_1 = arith.constant 0 : i32
    return %c0_i32, %c0_i32_0 : i32, i32
  }
  func.func @transform_6(%arg0: i32, %arg1: i32) -> (i32, i32) {
    %c0_i32 = arith.constant 0 : i32
    %c0_i32_0 = arith.constant 0 : i32
    return %arg0, %c0_i32 : i32, i32
  }
}

</mosaic_0001>

<bundles_post_ra>
// kernel: transformer_forward.13
= control target key start
LH: loop header
LB: loop body
LE: loop exit
PB: predicated region body
PF: predicated region fallthrough
CT: control target
= control target key end

     0   :  { %vm28_vm0 = vcmask 261120   ;;  %v220_v0 = vmov 0.0   ;;  %vm221_vm1 = vmmov 0   ;;  %vm178_vm2 = vcmask 257024   ;;  %s293_s1 = inlined_call_operand.vmem [shape: bf16[32,32], index: 1, kind: input, shape index: {}]   ;;  %s294_s0 = inlined_call_operand.vmem [shape: bf16[16,32], index: 0, kind: input, shape index: {}]   ;;  %s295_s3 = inlined_call_operand.vmem [shape: bf16[16,32], index: 3, kind: input, shape index: {}]   ;;  %s296_s2 = inlined_call_operand.vmem [shape: f32[1,32], index: 2, kind: input, shape index: {}]   ;;  %s297_s4 = inlined_call_operand.vmem [shape: f32[1,32], index: 4, kind: input, shape index: {}]   ;;  %s298_s5 = inlined_call_operand.vmem [shape: f32[1,32], index: 5, kind: input, shape index: {}]   ;;  %s299_s6 = inlined_call_operand.vmem [shape: bf16[16,32], index: 6, kind: output, shape index: {}]  }
   0x1   :  { %203 = vmatprep.subr.bf16.mxu0 %v220_v0  ;;  %v213_v1 = vld [vmem:[%s293_s1] sm:$0xff]   ;;  %207 = vmatprep.mubr.msk.bf16.mxu0 %vm221_vm1, %v220_v0  ;;  %29 = vst.msk [vmem:[#allocation2] sm:$0xff] %vm28_vm0, %v220_v0  ;;  %30 = vst.msk [vmem:[#allocation2 + $0x8] sm:$0xff] %vm28_vm0, %v220_v0  ;;  %v214_v2 = vld [vmem:[%s293_s1 + $0x8] sm:$0xff]  }
   0x2   :  { %204 = vmatpush3.bf16.msra.mxu0 %v213_v1  ;;  %v215_v3 = vld [vmem:[%s294_s0] sm:$0xff]  }
   0x3   :  { %205 = vmatprep.subr.bf16.mxu0 %v220_v0  ;;  %v197_v12 = vld [vmem:[%s295_s3] sm:$0xff]  }
   0x4   :  { %v189_v13 = vld [vmem:[%s296_s2] ss:$0 sm:$0xff]  ;;  %v198_v14 = vunpack.c.l.bf16 %v197_v12  ;;  %v199_v17 = vunpack.c.h.bf16 %v197_v12 }
   0x5   :  { %v190_v41 = vld [vmem:[%s297_s4] ss:$0 sm:$0xff] }
   0x6   :  { %206 = vmatpush3.bf16.msra.mxu0 %v214_v2  ;;  %v191_v43 = vld [vmem:[%s298_s5] ss:$0 sm:$0xff] }
   0x8   :  { %v31_v4 = vld [vmem:[#allocation2] sm:$0xff]  ;;  %v32_v6 = vld [vmem:[#allocation2 + $0x8] sm:$0xff] }
   0x9   :  { %208 = vmatmul.mubr.msk.bf16.vlgmr.msra.gmra.mrb[0].mxu0 %vm28_vm0, %v215_v3 }
  0xdc   :  { %v94_v5 = vpop.f32.mrb[0].mxu0 }
  0xdd   :  { %v101_v7 = vadd.f32 %v94_v5, %v31_v4  ;;  %v209_v8 = vpop.f32.mrb[1].mxu0 }
  0xde   :  { %v97_v9 = vpop.f32.mrb[2].mxu0 }
  0xdf   :  { %103 = vst.msk [vmem:[#allocation2] sm:$0xff] %vm28_vm0, %v101_v7  ;;  %v102_v10 = vadd.f32 %v97_v9, %v32_v6  ;;  %v210_v11 = vpop.f32.mrb[3].mxu0 }
  0xe1   :  { %104 = vst.msk [vmem:[#allocation2 + $0x8] sm:$0xff] %vm28_vm0, %v102_v10 }
  0xe6   :  { %v108_v15 = vld [vmem:[#allocation2] sm:$0xff] }
  0xe7   :  { %v117_v16 = vadd.f32 %v189_v13, %v108_v15 }
  0xe8   :  { %v109_v18 = vld [vmem:[#allocation2 + $0x8] sm:$0xff] }
  0xe9   :  { %v123_v19 = vadd.f32 %v198_v14, %v117_v16  ;;  %v118_v20 = vadd.f32 %v189_v13, %v109_v18 }
  0xeb   :  { %v125_v21 = vsel %vm28_vm0, %v123_v19, 0.0  ;;  %v124_v22 = vadd.f32 %v199_v17, %v118_v20 }
  0xec   :  { %126 = vadd.xlane.f32.xlu0 %v125_v21 }
  0xed   :  { %v128_v23 = vsel %vm28_vm0, %v124_v22, 0.0 }
  0xf0   :  { %129 = vadd.xlane.f32.xlu0 %v128_v23 }
 0x179   :  { %v127_v24 = vpop.xlane.xlu0 %126 }
 0x17a   :  { %v132_v25 = vmul.f32 0.03125, %v127_v24 }
 0x17c   :  { %v134_v26 = vsub.f32 %v123_v19, %v132_v25 }
 0x17d   :  { %v130_v27 = vpop.xlane.xlu0 %129 }
 0x17e   :  { %v133_v28 = vmul.f32 0.03125, %v130_v27  ;;  %v136_v29 = vmul.f32 %v134_v26, %v134_v26 }
 0x180   :  { %v135_v30 = vsub.f32 %v124_v22, %v133_v28  ;;  %v138_v31 = vsel %vm28_vm0, %v136_v29, 0.0 }
 0x181   :  { %139 = vadd.xlane.f32.xlu1 %v138_v31 }
 0x182   :  { %v137_v32 = vmul.f32 %v135_v30, %v135_v30 }
 0x184   :  { %v141_v33 = vsel %vm28_vm0, %v137_v32, 0.0 }
 0x185   :  { %142 = vadd.xlane.f32.xlu1 %v141_v33 }
 0x20e   :  { %v140_v34 = vpop.xlane.xlu1 %139 }
 0x20f   :  { %v144_v35 = vmul.f32 0.03125, %v140_v34 }
 0x211   :  { %v146_v36 = vadd.f32 1e-05, %v144_v35 }
 0x212   :  { %v143_v37 = vpop.xlane.xlu1 %142 }
 0x213   :  { %216 = vrsqrt.f32 %v146_v36  ;;  %v145_v38 = vmul.f32 0.03125, %v143_v37 }
 0x215   :  { %v147_v39 = vadd.f32 1e-05, %v145_v38 }
 0x217   :  { %218 = vrsqrt.f32 %v147_v39 }
 0x21d   :  { %v217_v40 = vpop.eup %216 }
 0x21e   :  { %v150_v42 = vmul.f32 %v217_v40, %v134_v26 }
 0x220   :  { %v159_v44 = vmul.f32 %v190_v41, %v150_v42 }
 0x221   :  { %v219_v45 = vpop.eup %218 }
 0x222   :  { %v168_v46 = vadd.f32 %v191_v43, %v159_v44  ;;  %v151_v47 = vmul.f32 %v219_v45, %v135_v30 }
 0x224   :  { %v194_v48 = vpack.c.bf16 %v168_v46, %v168_v46  ;;  %v160_v49 = vmul.f32 %v190_v41, %v151_v47 }
 0x226   :  { %179 = vst.msk [vmem:[%s299_s6] sm:$0xf] %vm178_vm2, %v194_v48  ;;  %v169_v50 = vadd.f32 %v191_v43, %v160_v49 }
 0x228   :  { %v195_v51 = vpack.c.bf16 %v169_v50, %v169_v50 }
 0x22a   :  { %180 = vst.msk [vmem:[%s299_s6 + $0x4] sm:$0xf] %vm178_vm2, %v195_v51 }

// kernel: transformer_forward.14
= control target key start
LH: loop header
LB: loop body
LE: loop exit
PB: predicated region body
PF: predicated region fallthrough
CT: control target
= control target key end

     0   :  { %vm19_vm0 = vcmask 523264   ;;  %v153_v0 = vmov 0.0   ;;  %vm154_vm1 = vmmov 0   ;;  %vm47_vm2 = vcmask 261120   ;;  %s197_s1 = inlined_call_operand.vmem [shape: bf16[32,64], index: 1, kind: input, shape index: {}]   ;;  %s198_s0 = inlined_call_operand.vmem [shape: bf16[16,32], index: 0, kind: input, shape index: {}]   ;;  %s199_s2 = inlined_call_operand.vmem [shape: f32[1,64], index: 2, kind: input, shape index: {}]   ;;  %s200_s3 = inlined_call_operand.vmem [shape: bf16[16,64], index: 3, kind: output, shape index: {}]  }
   0x1   :  { %140 = vmatprep.subr.bf16.mxu0 %v153_v0  ;;  %v150_v1 = vld [vmem:[%s197_s1] sm:$0xff]   ;;  %144 = vmatprep.mubr.msk.bf16.mxu0 %vm154_vm1, %v153_v0  ;;  %20 = vst.msk [vmem:[#allocation2] sm:$0xff] %vm19_vm0, %v153_v0  ;;  %21 = vst.msk [vmem:[#allocation2 + $0x8] sm:$0xff] %vm19_vm0, %v153_v0  ;;  %v151_v2 = vld [vmem:[%s197_s1 + $0x8] sm:$0xff]   ;;  %vm121_vm3 = vcmask 519168  }
   0x2   :  { %141 = vmatpush3.bf16.msra.mxu0 %v150_v1  ;;  %v152_v3 = vld [vmem:[%s198_s0] sm:$0xff]  }
   0x3   :  { %142 = vmatprep.subr.bf16.mxu0 %v153_v0  ;;  %v132_v12 = vld [vmem:[%s199_s2] ss:$0 sm:$0xff] }
   0x6   :  { %143 = vmatpush3.bf16.msra.mxu0 %v151_v2 }
   0x8   :  { %v22_v4 = vld [vmem:[#allocation2] sm:$0xff]  ;;  %v23_v6 = vld [vmem:[#allocation2 + $0x8] sm:$0xff] }
   0x9   :  { %145 = vmatmul.mubr.msk.bf16.vlgmr.msra.gmra.mrb[0].mxu0 %vm47_vm2, %v152_v3 }
  0xdc   :  { %v85_v5 = vpop.f32.mrb[0].mxu0 }
  0xdd   :  { %v92_v7 = vadd.f32 %v85_v5, %v22_v4  ;;  %v146_v8 = vpop.f32.mrb[1].mxu0 }
  0xde   :  { %v88_v9 = vpop.f32.mrb[2].mxu0 }
  0xdf   :  { %95 = vst.msk [vmem:[#allocation2] sm:$0xff] %vm19_vm0, %v92_v7  ;;  %v93_v10 = vadd.f32 %v88_v9, %v23_v6  ;;  %v147_v11 = vpop.f32.mrb[3].mxu0 }
  0xe1   :  { %96 = vst.msk [vmem:[#allocation2 + $0x8] sm:$0xff] %vm19_vm0, %v93_v10 }
  0xe6   :  { %v100_v13 = vld [vmem:[#allocation2] sm:$0xff] }
  0xe7   :  { %v109_v14 = vadd.f32 %v132_v12, %v100_v13 }
  0xe8   :  { %v101_v15 = vld [vmem:[#allocation2 + $0x8] sm:$0xff] }
  0xe9   :  { %v111_v16 = vmax.f32 %v109_v14, 0.0  ;;  %v110_v17 = vadd.f32 %v132_v12, %v101_v15 }
  0xeb   :  { %v135_v18 = vpack.c.bf16 %v111_v16, %v111_v16  ;;  %v112_v19 = vmax.f32 %v110_v17, 0.0 }
  0xed   :  { %122 = vst.msk [vmem:[%s200_s3] sm:$0xf] %vm121_vm3, %v135_v18  ;;  %v136_v20 = vpack.c.bf16 %v112_v19, %v112_v19 }
  0xef   :  { %123 = vst.msk [vmem:[%s200_s3 + $0x4] sm:$0xf] %vm121_vm3, %v136_v20 }

// kernel: transformer_forward.11
= control target key start
LH: loop header
LB: loop body
LE: loop exit
PB: predicated region body
PF: predicated region fallthrough
CT: control target
= control target key end

     0   :  { %vm19_vm0 = vcmask 785408   ;;  %v151_v0 = vmov 0.0   ;;  %vm152_vm1 = vmmov 0   ;;  %vm47_vm2 = vcmask 261120   ;;  %s195_s1 = inlined_call_operand.vmem [shape: bf16[32,96], index: 1, kind: input, shape index: {}]   ;;  %s196_s0 = inlined_call_operand.vmem [shape: bf16[16,32], index: 0, kind: input, shape index: {}]   ;;  %s197_s2 = inlined_call_operand.vmem [shape: f32[1,96], index: 2, kind: input, shape index: {}]   ;;  %s198_s3 = inlined_call_operand.vmem [shape: bf16[16,96], index: 3, kind: output, shape index: {}]  }
   0x1   :  { %138 = vmatprep.subr.bf16.mxu0 %v151_v0  ;;  %v148_v1 = vld [vmem:[%s195_s1] sm:$0xff]   ;;  %142 = vmatprep.mubr.msk.bf16.mxu0 %vm152_vm1, %v151_v0  ;;  %20 = vst.msk [vmem:[#allocation2] sm:$0xff] %vm19_vm0, %v151_v0  ;;  %21 = vst.msk [vmem:[#allocation2 + $0x8] sm:$0xff] %vm19_vm0, %v151_v0  ;;  %v149_v2 = vld [vmem:[%s195_s1 + $0x8] sm:$0xff]   ;;  %vm119_vm3 = vcmask 781312  }
   0x2   :  { %139 = vmatpush3.bf16.msra.mxu0 %v148_v1  ;;  %v150_v3 = vld [vmem:[%s196_s0] sm:$0xff]  }
   0x3   :  { %140 = vmatprep.subr.bf16.mxu0 %v151_v0  ;;  %v130_v12 = vld [vmem:[%s197_s2] ss:$0 sm:$0xff] }
   0x6   :  { %141 = vmatpush3.bf16.msra.mxu0 %v149_v2 }
   0x8   :  { %v22_v4 = vld [vmem:[#allocation2] sm:$0xff]  ;;  %v23_v6 = vld [vmem:[#allocation2 + $0x8] sm:$0xff] }
   0x9   :  { %143 = vmatmul.mubr.msk.bf16.vlgmr.msra.gmra.mrb[0].mxu0 %vm47_vm2, %v150_v3 }
  0xdc   :  { %v85_v5 = vpop.f32.mrb[0].mxu0 }
  0xdd   :  { %v92_v7 = vadd.f32 %v85_v5, %v22_v4  ;;  %v144_v8 = vpop.f32.mrb[1].mxu0 }
  0xde   :  { %v88_v9 = vpop.f32.mrb[2].mxu0 }
  0xdf   :  { %95 = vst.msk [vmem:[#allocation2] sm:$0xff] %vm19_vm0, %v92_v7  ;;  %v93_v10 = vadd.f32 %v88_v9, %v23_v6  ;;  %v145_v11 = vpop.f32.mrb[3].mxu0 }
  0xe1   :  { %96 = vst.msk [vmem:[#allocation2 + $0x8] sm:$0xff] %vm19_vm0, %v93_v10 }
  0xe6   :  { %v100_v13 = vld [vmem:[#allocation2] sm:$0xff] }
  0xe7   :  { %v109_v14 = vadd.f32 %v130_v12, %v100_v13 }
  0xe8   :  { %v101_v15 = vld [vmem:[#allocation2 + $0x8] sm:$0xff] }
  0xe9   :  { %v133_v16 = vpack.c.bf16 %v109_v14, %v109_v14  ;;  %v110_v17 = vadd.f32 %v130_v12, %v101_v15 }
  0xeb   :  { %120 = vst.msk [vmem:[%s198_s3] sm:$0xf] %vm119_vm3, %v133_v16  ;;  %v134_v18 = vpack.c.bf16 %v110_v17, %v110_v17 }
  0xed   :  { %121 = vst.msk [vmem:[%s198_s3 + $0x4] sm:$0xf] %vm119_vm3, %v134_v18 }

// kernel: transformer_forward.12
= control target key start
LH: loop header
LB: loop body
LE: loop exit
PB: predicated region body
PF: predicated region fallthrough
CT: control target
= control target key end

     0   :  { %s800_s6 = smov 0   ;;  %s907_s0 = inlined_call_operand.vmem [shape: bf16[2,8,96], index: 0, kind: input, shape index: {}]   ;;  %s908_s1 = inlined_call_operand.vmem [shape: bf16[2,8,32], index: 1, kind: output, shape index: {}]  }
   0x1 LB: > { %s643_s7 = sadd.s32 4294967295, %s772_s6   ;;  %p647_p0 = scmp.ge.s32.totalorder %s772_s6, 1  ;;  %s772_s6 = sphi %s800_s6, %s11_s6  }
   0x2   : > { %p86_p1 = scmp.lt.s32.totalorder %s772_s6, 3 }
   0x4   : > { %p87_p2 = pnand %p647_p0, %p86_p1 }
   0x5   : > { %p104_p3 = scmp.lt.s32.totalorder (!%p87_p2), %s643_s7, 1  ;;  %v774_v0 = vmov (!%p87_p2), 0.0   ;;  %vm775_vm0 = vmmov (!%p87_p2), 0   ;;  %s776_s12 = smov (!%p87_p2), 96   ;;  %vm124_vm1 = vcmask (!%p87_p2), 64512   ;;  %v113_v5 = vlaneseq (!%p87_p2) }
   0x6   : > { %90 = sbr.rel (%p87_p2) target bundleno = 1604 (0x644), region = 24  ;;  %677 = vmatprep.subr.bf16.mxu0 (!%p87_p2), %v774_v0  ;;  %679 = vmatprep.mubr.msk.bf16.mxu0 (!%p87_p2), %vm775_vm0, %v774_v0  ;;  %s777_s13 = smov (!%p87_p2), 64   ;;  %vm190_vm3 = vcmask (!%p87_p2), 1043456   ;;  %vm583_vm4 = vcmask (!%p87_p2), 130048   ;;  %vm585_vm5 = vcmask (!%p87_p2), 195584   ;;  %vm588_vm6 = vcmask (!%p87_p2), 257024  }
   0x7   : > { %683 = vmatprep.subr.bf16.mxu1 (!%p87_p2), %v774_v0  ;;  %685 = vmatprep.mubr.msk.bf16.mxu1 (!%p87_p2), %vm775_vm0, %v774_v0  ;;  %s778_s14 = smov (!%p87_p2), 88   ;;  %v832_v6 = vshrl.u32 (!%p87_p2), %v113_v5, 7  ;;  %v834_v7 = vand.u32 (!%p87_p2), 127, %v113_v5  ;;  %s779_s15 = smov (!%p87_p2), 72  }
   0x8   : > { %s780_s16 = smov (!%p87_p2), 120   ;;  %s781_s17 = smov (!%p87_p2), 80  }
   0x9   : > { %vm117_vm2 = vcmp.le.s32.totalorder (!%p87_p2), %v834_v7, %v832_v6  ;;  %s782_s18 = smov (!%p87_p2), 112   ;;  %s783_s19 = smov (!%p87_p2), 104  }
   0xa   : > { %s784_s20 = smov (!%p87_p2), 56   ;;  %s785_s21 = smov (!%p87_p2), 48  }
   0xb   : > { %s786_s22 = smov (!%p87_p2), 40   ;;  %s787_s23 = smov (!%p87_p2), 8  }
   0xc   : > { %s788_s24 = smov (!%p87_p2), 16   ;;  %s789_s25 = smov (!%p87_p2), 24  }
   0xd   : > { %s910_s7 = smov (!%p104_p3, %s643_s7), 1 }
   0xe   : > { %s648_s8 = sshll.u32 %s910_s7, 2 }
   0xf   : > { %s107_s11 = scalar_lea.vmem %s907_s0, %s648_s8  ;;  %s111_s28 = scalar_lea.vmem %s908_s1, %s648_s8 }
  0x10   : > { %v118_v1 = vld [vmem:[%s107_s11] sm:$0xf] }
  0x11   : > { %v822_v2 = vcombine.low %v118_v1, %v118_v1 }
  0x13   : > { %122 = vrot.lane.b32.xlu0 %v822_v2, %s776_s12  ;;  %185 = vrot.lane.b32.xlu1 %v822_v2, %s777_s13 }
  0x17   : > { %236 = vrot.lane.b32.xlu1 %v822_v2, %s778_s14 }
  0x85   : > { %v123_v3 = vpop.permute.xlu0 %122  ;;  %v186_v15 = vpop.permute.xlu1 %185 }
  0x86   : > { %v129_v4 = vsel %vm124_vm1, %v123_v3, 0  ;;  %v192_v16 = vsel %vm190_vm3, %v186_v15, 0 }
  0x87   : > { %678 = vmatpush3.bf16.xpose.msra.mxu0 %v129_v4  ;;  %684 = vmatpush3.bf16.msra.mxu1 %v192_v16 }
  0x88   : > { %695 = vmatprep.subr.bf16.mxu0 %v774_v0  ;;  %689 = vmatprep.subr.bf16.mxu1 %v774_v0 }
  0x89   : > { %v237_v22 = vpop.permute.xlu1 %236 }
  0x8a   : > { %v242_v28 = vsel %vm124_vm1, %v237_v22, 0 }
  0x8e   : > { %680 = vmatmul.mubr.msk.bf16.vlgmr.msra.gmra.mrb[0].mxu0 %vm124_vm1, %v118_v1 }
  0x8f   : > { %697 = vmatprep.mubr.msk.bf16.mxu0 %vm775_vm0, %v774_v0 }
 0x161   : > { %v165_v8 = vpop.f32.mrb[0].mxu0 }
 0x162   : > { %v171_v9 = vmul.f32 0.35355338, %v165_v8  ;;  %v681_v10 = vpop.f32.mrb[1].mxu0 }
 0x163   : > { %v168_v11 = vpop.f32.mrb[2].mxu0 }
 0x164   : > { %v682_v12 = vpop.f32.mrb[3].mxu0  ;;  %v172_v13 = vsel %vm117_vm2, %v171_v9, -1e+30 }
 0x165   : > { %v173_v14 = vsel %vm124_vm1, %v172_v13, -inf }
 0x166   : > { %174 = vmax.xlane.f32.xlu0 %v173_v14 }
 0x17c   : > { %460 = vrot.lane.b32.xlu0 %v822_v2, %s779_s15 }
 0x1f3   : > { %v175_v17 = vpop.xlane.xlu0 %174 }
 0x1f4   : > { %v176_v18 = vsub.f32 %v172_v13, %v175_v17 }
 0x1f6   : > { %v177_v19 = vmul.f32 1.442695, %v176_v18 }
 0x1f7   : > { %v461_v31 = vpop.permute.xlu0 %460 }
 0x1f8   : > { %750 = vpow2.f32 %v177_v19  ;;  %v466_v33 = vsel %vm124_vm1, %v461_v31, 0 }
 0x202   : > { %v751_v20 = vpop.eup %750 }
 0x203   : > { %v179_v21 = vsel %vm124_vm1, %v751_v20, 0.0 }
 0x204   : > { %180 = vadd.xlane.f32.xlu1 %v179_v21 }
 0x215   : > { %234 = vrot.lane.b32.xlu1 %v822_v2, %s780_s16 }
 0x219   : > { %348 = vrot.lane.b32.xlu1 %v822_v2, %s781_s17 }
 0x21d   : > { %346 = vrot.lane.b32.xlu1 %v822_v2, %s782_s18 }
 0x221   : > { %458 = vrot.lane.b32.xlu1 %v822_v2, %s783_s19 }
 0x291   : > { %v181_v23 = vpop.xlane.xlu1 %180 }
 0x292   : > { %752 = vrcp.f32 %v181_v23 }
 0x295   : > { %v235_v26 = vpop.permute.xlu1 %234 }
 0x299   : > { %v349_v29 = vpop.permute.xlu1 %348 }
 0x29a   : > { %v354_v30 = vsel %vm124_vm1, %v349_v29, 0 }
 0x29c   : > { %v753_v24 = vpop.eup %752 }
 0x29d   : > { %v183_v25 = vmul.f32 %v753_v24, %v751_v20  ;;  %v347_v32 = vpop.permute.xlu1 %346 }
 0x29f   : > { %v184_v27 = vpack.c.bf16 %v183_v25, %v183_v25 }
 0x2a1   : > { %686 = vmatmul.mubr.msk.bf16.vlgmr.msra.gmra.mrb[0].mxu1 %vm124_vm1, %v184_v27  ;;  %v459_v34 = vpop.permute.xlu1 %458 }
 0x2a2   : > { %690 = vmatpush3.bf16.xpose.msra.mxu1 %v242_v28  ;;  %691 = vmatprep.mubr.msk.bf16.mxu1 %vm775_vm0, %v774_v0 }
 0x2a3   : > { %701 = vmatprep.subr.bf16.mxu1 %v774_v0 }
 0x2a9   : > { %692 = vmatmul.mubr.msk.bf16.vlgmr.msra.gmra.mrb[4].mxu1 %vm124_vm1, %v235_v26 }
 0x2aa   : > { %702 = vmatpush3.bf16.xpose.msra.mxu1 %v354_v30  ;;  %703 = vmatprep.mubr.msk.bf16.mxu1 %vm775_vm0, %v774_v0 }
 0x2ab   : > { %713 = vmatprep.subr.bf16.mxu1 %v774_v0 }
 0x2b1   : > { %704 = vmatmul.mubr.msk.bf16.vlgmr.msra.gmra.mrb[8].mxu1 %vm124_vm1, %v347_v32 }
 0x2b2   : > { %714 = vmatpush3.bf16.xpose.msra.mxu1 %v466_v33  ;;  %715 = vmatprep.mubr.msk.bf16.mxu1 %vm775_vm0, %v774_v0 }
 0x2b9   : > { %716 = vmatmul.mubr.msk.bf16.vlgmr.msra.gmra.mrb[12].mxu1 %vm124_vm1, %v459_v34 }
 0x374   : > { %v865_v35 = vpop.f32.mrb[0].mxu1 }
 0x375   : > { %v687_v36 = vpop.f32.mrb[1].mxu1 }
 0x376   : > { %v231_v37 = vpop.f32.mrb[2].mxu1 }
 0x377   : > { %v688_v38 = vpop.f32.mrb[3].mxu1 }
 0x37c   : > { %v278_v39 = vpop.f32.mrb[4].mxu1 }
 0x37d   : > { %v284_v40 = vmul.f32 0.35355338, %v278_v39  ;;  %v693_v41 = vpop.f32.mrb[5].mxu1 }
 0x37e   : > { %v281_v42 = vpop.f32.mrb[6].mxu1 }
 0x37f   : > { %v694_v43 = vpop.f32.mrb[7].mxu1  ;;  %v285_v44 = vsel %vm117_vm2, %v284_v40, -1e+30 }
 0x380   : > { %v286_v45 = vsel %vm124_vm1, %v285_v44, -inf }
 0x381   : > { %287 = vmax.xlane.f32.xlu1 %v286_v45 }
 0x384   : > { %v390_v46 = vpop.f32.mrb[8].mxu1 }
 0x385   : > { %v396_v47 = vmul.f32 0.35355338, %v390_v46  ;;  %v705_v48 = vpop.f32.mrb[9].mxu1 }
 0x386   : > { %v393_v49 = vpop.f32.mrb[10].mxu1 }
 0x387   : > { %v397_v50 = vsel %vm117_vm2, %v396_v47, -1e+30  ;;  %v706_v51 = vpop.f32.mrb[11].mxu1 }
 0x388   : > { %v398_v52 = vsel %vm124_vm1, %v397_v50, -inf }
 0x389   : > { %399 = vmax.xlane.f32.xlu0 %v398_v52 }
 0x38c   : > { %v502_v53 = vpop.f32.mrb[12].mxu1 }
 0x38d   : > { %v508_v54 = vmul.f32 0.35355338, %v502_v53  ;;  %v717_v55 = vpop.f32.mrb[13].mxu1 }
 0x38e   : > { %v505_v56 = vpop.f32.mrb[14].mxu1 }
 0x38f   : > { %v509_v57 = vsel %vm117_vm2, %v508_v54, -1e+30  ;;  %v718_v58 = vpop.f32.mrb[15].mxu1 }
 0x390   : > { %v510_v59 = vsel %vm124_vm1, %v509_v57, -inf }
 0x391   : > { %511 = vmax.xlane.f32.xlu1 %v510_v59 }
 0x40e   : > { %v288_v60 = vpop.xlane.xlu1 %287 }
 0x40f   : > { %v289_v61 = vsub.f32 %v285_v44, %v288_v60 }
 0x411   : > { %v290_v62 = vmul.f32 1.442695, %v289_v61 }
 0x413   : > { %754 = vpow2.f32 %v290_v62 }
 0x416   : > { %v400_v7 = vpop.xlane.xlu0 %399 }
 0x417   : > { %v401_v9 = vsub.f32 %v397_v50, %v400_v7 }
 0x419   : > { %v402_v10 = vmul.f32 1.442695, %v401_v9 }
 0x41d   : > { %v755_v63 = vpop.eup %754 }
 0x41e   : > { %v512_v1 = vpop.xlane.xlu1 %511  ;;  %v292_v3 = vsel %vm124_vm1, %v755_v63, 0.0 }
 0x41f   : > { %v513_v4 = vsub.f32 %v509_v57, %v512_v1  ;;  %293 = vadd.xlane.f32.xlu1 %v292_v3 }
 0x421   : > { %v514_v5 = vmul.f32 1.442695, %v513_v4 }
 0x423   : > { %756 = vpow2.f32 %v514_v5 }
 0x424   : > { %758 = vpow2.f32 %v402_v10 }
 0x42d   : > { %v757_v8 = vpop.eup %756 }
 0x42e   : > { %v516_v6 = vsel %vm124_vm1, %v757_v8, 0.0  ;;  %v759_v11 = vpop.eup %758 }
 0x42f   : > { %517 = vadd.xlane.f32.xlu0 %v516_v6  ;;  %v404_v12 = vsel %vm124_vm1, %v759_v11, 0.0 }
 0x430   : > { %298 = vrot.lane.b32.xlu1 %v822_v2, %s784_s20 }
 0x445   : > { %410 = vrot.lane.b32.xlu0 %v822_v2, %s785_s21 }
 0x454   : > { %405 = vadd.xlane.f32.xlu1 %v404_v12 }
 0x465   : > { %522 = vrot.lane.b32.xlu1 %v822_v2, %s786_s22 }
 0x4ac   : > { %v294_v13 = vpop.xlane.xlu1 %293 }
 0x4ad   : > { %760 = vrcp.f32 %v294_v13 }
 0x4b0   : > { %v299_v14 = vpop.permute.xlu1 %298 }
 0x4b1   : > { %v304_v15 = vsel %vm190_vm3, %v299_v14, 0 }
 0x4b2   : > { %696 = vmatpush3.bf16.msra.mxu0 %v304_v15 }
 0x4b3   : > { %707 = vmatprep.subr.bf16.mxu0 %v774_v0 }
 0x4b7   : > { %v761_v16 = vpop.eup %760 }
 0x4b8   : > { %v296_v17 = vmul.f32 %v761_v16, %v755_v63 }
 0x4ba   : > { %v297_v18 = vpack.c.bf16 %v296_v17, %v296_v17 }
 0x4bc   : > { %698 = vmatmul.mubr.msk.bf16.vlgmr.msra.gmra.mrb[4].mxu0 %vm124_vm1, %v297_v18  ;;  %v518_v19 = vpop.xlane.xlu0 %517 }
 0x4bd   : > { %709 = vmatprep.mubr.msk.bf16.mxu0 %vm775_vm0, %v774_v0 }
 0x4c0   : > { %v411_v20 = vpop.permute.xlu0 %410 }
 0x4c1   : > { %v416_v2 = vsel %vm190_vm3, %v411_v20, 0 }
 0x4c2   : > { %708 = vmatpush3.bf16.msra.mxu0 %v416_v2 }
 0x4c3   : > { %719 = vmatprep.subr.bf16.mxu0 %v774_v0 }
 0x4e1   : > { %v406_v21 = vpop.xlane.xlu1 %405 }
 0x4e2   : > { %762 = vrcp.f32 %v406_v21 }
 0x4e3   : > { %764 = vrcp.f32 %v518_v19 }
 0x4e5   : > { %v523_v23 = vpop.permute.xlu1 %522 }
 0x4e6   : > { %v528_v25 = vsel %vm190_vm3, %v523_v23, 0 }
 0x4ec   : > { %v763_v22 = vpop.eup %762 }
 0x4ed   : > { %v408_v24 = vmul.f32 %v763_v22, %v759_v11  ;;  %v765_v27 = vpop.eup %764 }
 0x4ee   : > { %v520_v28 = vmul.f32 %v765_v27, %v757_v8 }
 0x4ef   : > { %v409_v26 = vpack.c.bf16 %v408_v24, %v408_v24 }
 0x4f0   : > { %v521_v29 = vpack.c.bf16 %v520_v28, %v520_v28 }
 0x4f1   : > { %710 = vmatmul.mubr.msk.bf16.vlgmr.msra.gmra.mrb[8].mxu0 %vm124_vm1, %v409_v26 }
 0x4f2   : > { %720 = vmatpush3.bf16.msra.mxu0 %v528_v25  ;;  %721 = vmatprep.mubr.msk.bf16.mxu0 %vm775_vm0, %v774_v0 }
 0x4f9   : > { %722 = vmatmul.mubr.msk.bf16.vlgmr.msra.gmra.mrb[12].mxu0 %vm124_vm1, %v521_v29 }
 0x58f   : > { %v340_v30 = vpop.f32.mrb[4].mxu0 }
 0x590   : > { %571 = vrot.lane.b32.xlu1 %v340_v30, %s787_s23  ;;  %v699_v31 = vpop.f32.mrb[5].mxu0 }
 0x591   : > { %v343_v32 = vpop.f32.mrb[6].mxu0 }
 0x592   : > { %v700_v33 = vpop.f32.mrb[7].mxu0 }
 0x5c4   : > { %v452_v34 = vpop.f32.mrb[8].mxu0 }
 0x5c5   : > { %575 = vrot.lane.b32.xlu0 %v452_v34, %s788_s24  ;;  %v711_v36 = vpop.f32.mrb[9].mxu0 }
 0x5c6   : > { %v455_v37 = vpop.f32.mrb[10].mxu0 }
 0x5c7   : > { %v712_v38 = vpop.f32.mrb[11].mxu0 }
 0x5cc   : > { %v564_v39 = vpop.f32.mrb[12].mxu0 }
 0x5cd   : > { %579 = vrot.lane.b32.xlu1 %v564_v39, %s789_s25  ;;  %v723_v0 = vpop.f32.mrb[13].mxu0 }
 0x5ce   : > { %v567_v40 = vpop.f32.mrb[14].mxu0 }
 0x5cf   : > { %v724_v41 = vpop.f32.mrb[15].mxu0 }
 0x602   : > { %v572_v42 = vpop.permute.xlu1 %571 }
 0x603   : > { %v582_v44 = vsel %vm124_vm1, %v865_v35, %v572_v42 }
 0x637   : > { %v576_v43 = vpop.permute.xlu0 %575 }
 0x638   : > { %v584_v45 = vsel %vm583_vm4, %v582_v44, %v576_v43 }
 0x63f   : > { %v580_v46 = vpop.permute.xlu1 %579 }
 0x640   : > { %v586_v47 = vsel %vm585_vm5, %v584_v45, %v580_v46 }
 0x641   : > { %v587_v48 = vpack.c.bf16 %v586_v47, %v586_v47 }
 0x643   : > { %589 = vst.msk [vmem:[%s111_s28] sm:$0xf] %vm588_vm6, %v587_v48 }
 0x644 PF: > { %s11_s6 = sadd.s32 1, %s772_s6  }
 0x645   : > { %p8_p4 = scmp.ge.s32.totalorder %s11_s6, 4  }
 0x647   :  { %10 = sbr.rel (!%p8_p4) target bundleno = 1 (0x1), region = 54 }

// kernel: transformer_forward.21
= control target key start
LH: loop header
LB: loop body
LE: loop exit
PB: predicated region body
PF: predicated region fallthrough
CT: control target
= control target key end

     0   :  { %vm19_vm0 = vcmask 261120   ;;  %v137_v0 = vmov 0.0   ;;  %vm138_vm1 = vmmov 0   ;;  %s184_s1 = inlined_call_operand.vmem [shape: bf16[32,32], index: 1, kind: input, shape index: {}]   ;;  %s185_s0 = inlined_call_operand.vmem [shape: bf16[16,32], index: 0, kind: input, shape index: {}]   ;;  %s186_s2 = inlined_call_operand.vmem [shape: f32[1,32], index: 2, kind: input, shape index: {}]   ;;  %s187_s3 = inlined_call_operand.vmem [shape: f32[16,32], index: 3, kind: output, shape index: {}]  }
   0x1   :  { %124 = vmatprep.subr.bf16.mxu0 %v137_v0  ;;  %v134_v1 = vld [vmem:[%s184_s1] sm:$0xff]   ;;  %128 = vmatprep.mubr.msk.bf16.mxu0 %vm138_vm1, %v137_v0  ;;  %20 = vst.msk [vmem:[#allocation2] sm:$0xff] %vm19_vm0, %v137_v0  ;;  %21 = vst.msk [vmem:[#allocation2 + $0x8] sm:$0xff] %vm19_vm0, %v137_v0  ;;  %v135_v2 = vld [vmem:[%s184_s1 + $0x8] sm:$0xff]  }
   0x2   :  { %125 = vmatpush3.bf16.msra.mxu0 %v134_v1  ;;  %v136_v3 = vld [vmem:[%s185_s0] sm:$0xff]  }
   0x3   :  { %126 = vmatprep.subr.bf16.mxu0 %v137_v0  ;;  %v120_v12 = vld [vmem:[%s186_s2] ss:$0 sm:$0xff] }
   0x6   :  { %127 = vmatpush3.bf16.msra.mxu0 %v135_v2 }
   0x8   :  { %v22_v4 = vld [vmem:[#allocation2] sm:$0xff]  ;;  %v23_v6 = vld [vmem:[#allocation2 + $0x8] sm:$0xff] }
   0x9   :  { %129 = vmatmul.mubr.msk.bf16.vlgmr.msra.gmra.mrb[0].mxu0 %vm19_vm0, %v136_v3 }
  0xdc   :  { %v85_v5 = vpop.f32.mrb[0].mxu0 }
  0xdd   :  { %v92_v7 = vadd.f32 %v85_v5, %v22_v4  ;;  %v130_v8 = vpop.f32.mrb[1].mxu0 }
  0xde   :  { %v88_v9 = vpop.f32.mrb[2].mxu0 }
  0xdf   :  { %94 = vst.msk [vmem:[#allocation2] sm:$0xff] %vm19_vm0, %v92_v7  ;;  %v93_v10 = vadd.f32 %v88_v9, %v23_v6  ;;  %v131_v11 = vpop.f32.mrb[3].mxu0 }
  0xe1   :  { %95 = vst.msk [vmem:[#allocation2 + $0x8] sm:$0xff] %vm19_vm0, %v93_v10 }
  0xe6   :  { %v99_v13 = vld [vmem:[#allocation2] sm:$0xff] }
  0xe7   :  { %v108_v14 = vadd.f32 %v120_v12, %v99_v13 }
  0xe8   :  { %v100_v15 = vld [vmem:[#allocation2 + $0x8] sm:$0xff] }
  0xe9   :  { %110 = vst.msk [vmem:[%s187_s3] sm:$0xff] %vm19_vm0, %v108_v14  ;;  %v109_v16 = vadd.f32 %v120_v12, %v100_v15 }
  0xeb   :  { %111 = vst.msk [vmem:[%s187_s3 + $0x8] sm:$0xff] %vm19_vm0, %v109_v16 }

// kernel: transformer_forward.15
= control target key start
LH: loop header
LB: loop body
LE: loop exit
PB: predicated region body
PF: predicated region fallthrough
CT: control target
= control target key end

     0   :  { %vm28_vm0 = vcmask 261120   ;;  %v247_v0 = vmov 0.0   ;;  %vm248_vm1 = vmmov 0   ;;  %vm72_vm2 = vcmask 523264   ;;  %s325_s1 = inlined_call_operand.vmem [shape: bf16[64,32], index: 1, kind: input, shape index: {}]   ;;  %s326_s0 = inlined_call_operand.vmem [shape: bf16[16,64], index: 0, kind: input, shape index: {}]   ;;  %s327_s3 = inlined_call_operand.vmem [shape: bf16[16,32], index: 3, kind: input, shape index: {}]   ;;  %s328_s2 = inlined_call_operand.vmem [shape: f32[1,32], index: 2, kind: input, shape index: {}]   ;;  %s329_s4 = inlined_call_operand.vmem [shape: f32[1,32], index: 4, kind: input, shape index: {}]   ;;  %s330_s5 = inlined_call_operand.vmem [shape: f32[1,32], index: 5, kind: input, shape index: {}]   ;;  %s331_s6 = inlined_call_operand.vmem [shape: bf16[16,32], index: 6, kind: output, shape index: {}]  }
   0x1   :  { %224 = vmatprep.subr.bf16.mxu0 %v247_v0  ;;  %v238_v1 = vld [vmem:[%s325_s1] sm:$0xff]   ;;  %232 = vmatprep.mubr.msk.bf16.mxu0 %vm248_vm1, %v247_v0  ;;  %29 = vst.msk [vmem:[#allocation2] sm:$0xff] %vm28_vm0, %v247_v0  ;;  %30 = vst.msk [vmem:[#allocation2 + $0x8] sm:$0xff] %vm28_vm0, %v247_v0  ;;  %v239_v2 = vld [vmem:[%s325_s1 + $0x8] sm:$0xff]   ;;  %vm195_vm3 = vcmask 257024  }
   0x2   :  { %225 = vmatpush3.bf16.msra.mxu0 %v238_v1  ;;  %v240_v3 = vld [vmem:[%s325_s1 + $0x10] sm:$0xff]   ;;  %v241_v4 = vld [vmem:[%s325_s1 + $0x18] sm:$0xff]   ;;  %v242_v5 = vld [vmem:[%s326_s0] sm:$0xff]  }
   0x3   :  { %226 = vmatprep.subr.bf16.mxu0 %v247_v0  ;;  %v216_v14 = vld [vmem:[%s327_s3] sm:$0xff]  }
   0x4   :  { %v208_v15 = vld [vmem:[%s328_s2] ss:$0 sm:$0xff]  ;;  %v217_v16 = vunpack.c.l.bf16 %v216_v14  ;;  %v218_v19 = vunpack.c.h.bf16 %v216_v14 }
   0x5   :  { %v209_v43 = vld [vmem:[%s329_s4] ss:$0 sm:$0xff] }
   0x6   :  { %227 = vmatpush3.bf16.msra.mxu0 %v239_v2  ;;  %v210_v45 = vld [vmem:[%s330_s5] ss:$0 sm:$0xff] }
   0x7   :  { %228 = vmatprep.subr.bf16.mxu0 %v247_v0 }
   0x8   :  { %v31_v6 = vld [vmem:[#allocation2] sm:$0xff]  ;;  %v32_v8 = vld [vmem:[#allocation2 + $0x8] sm:$0xff] }
   0xa   :  { %229 = vmatpush3.bf16.msra.mxu0 %v240_v3 }
   0xb   :  { %230 = vmatprep.subr.bf16.mxu0 %v247_v0 }
   0xe   :  { %231 = vmatpush3.bf16.msra.mxu0 %v241_v4 }
  0x11   :  { %233 = vmatmul.mubr.msk.bf16.vlgmr.msra.gmra.mrb[0].mxu0 %vm72_vm2, %v242_v5 }
  0xe4   :  { %v110_v7 = vpop.f32.mrb[0].mxu0 }
  0xe5   :  { %v117_v9 = vadd.f32 %v110_v7, %v31_v6  ;;  %v234_v10 = vpop.f32.mrb[1].mxu0 }
  0xe6   :  { %v113_v11 = vpop.f32.mrb[2].mxu0 }
  0xe7   :  { %120 = vst.msk [vmem:[#allocation2] sm:$0xff] %vm28_vm0, %v117_v9  ;;  %v118_v12 = vadd.f32 %v113_v11, %v32_v8  ;;  %v235_v13 = vpop.f32.mrb[3].mxu0 }
  0xe9   :  { %121 = vst.msk [vmem:[#allocation2 + $0x8] sm:$0xff] %vm28_vm0, %v118_v12 }
  0xee   :  { %v125_v17 = vld [vmem:[#allocation2] sm:$0xff] }
  0xef   :  { %v134_v18 = vadd.f32 %v208_v15, %v125_v17 }
  0xf0   :  { %v126_v20 = vld [vmem:[#allocation2 + $0x8] sm:$0xff] }
  0xf1   :  { %v140_v21 = vadd.f32 %v217_v16, %v134_v18  ;;  %v135_v22 = vadd.f32 %v208_v15, %v126_v20 }
  0xf3   :  { %v142_v23 = vsel %vm28_vm0, %v140_v21, 0.0  ;;  %v141_v24 = vadd.f32 %v218_v19, %v135_v22 }
  0xf4   :  { %143 = vadd.xlane.f32.xlu0 %v142_v23 }
  0xf5   :  { %v145_v25 = vsel %vm28_vm0, %v141_v24, 0.0 }
  0xf8   :  { %146 = vadd.xlane.f32.xlu0 %v145_v25 }
 0x181   :  { %v144_v26 = vpop.xlane.xlu0 %143 }
 0x182   :  { %v149_v27 = vmul.f32 0.03125, %v144_v26 }
 0x184   :  { %v151_v28 = vsub.f32 %v140_v21, %v149_v27 }
 0x185   :  { %v147_v29 = vpop.xlane.xlu0 %146 }
 0x186   :  { %v150_v30 = vmul.f32 0.03125, %v147_v29  ;;  %v153_v31 = vmul.f32 %v151_v28, %v151_v28 }
 0x188   :  { %v152_v32 = vsub.f32 %v141_v24, %v150_v30  ;;  %v155_v33 = vsel %vm28_vm0, %v153_v31, 0.0 }
 0x189   :  { %156 = vadd.xlane.f32.xlu1 %v155_v33 }
 0x18a   :  { %v154_v34 = vmul.f32 %v152_v32, %v152_v32 }
 0x18c   :  { %v158_v35 = vsel %vm28_vm0, %v154_v34, 0.0 }
 0x18d   :  { %159 = vadd.xlane.f32.xlu1 %v158_v35 }
 0x216   :  { %v157_v36 = vpop.xlane.xlu1 %156 }
 0x217   :  { %v161_v37 = vmul.f32 0.03125, %v157_v36 }
 0x219   :  { %v163_v38 = vadd.f32 1e-05, %v161_v37 }
 0x21a   :  { %v160_v39 = vpop.xlane.xlu1 %159 }
 0x21b   :  { %243 = vrsqrt.f32 %v163_v38  ;;  %v162_v40 = vmul.f32 0.03125, %v160_v39 }
 0x21d   :  { %v164_v41 = vadd.f32 1e-05, %v162_v40 }
 0x21f   :  { %245 = vrsqrt.f32 %v164_v41 }
 0x225   :  { %v244_v42 = vpop.eup %243 }
 0x226   :  { %v167_v44 = vmul.f32 %v244_v42, %v151_v28 }
 0x228   :  { %v176_v46 = vmul.f32 %v209_v43, %v167_v44 }
 0x229   :  { %v246_v47 = vpop.eup %245 }
 0x22a   :  { %v185_v48 = vadd.f32 %v210_v45, %v176_v46  ;;  %v168_v49 = vmul.f32 %v246_v47, %v152_v32 }
 0x22c   :  { %v213_v50 = vpack.c.bf16 %v185_v48, %v185_v48  ;;  %v177_v51 = vmul.f32 %v209_v43, %v168_v49 }
 0x22e   :  { %196 = vst.msk [vmem:[%s331_s6] sm:$0xf] %vm195_vm3, %v213_v50  ;;  %v186_v52 = vadd.f32 %v210_v45, %v177_v51 }
 0x230   :  { %v214_v53 = vpack.c.bf16 %v186_v52, %v186_v52 }
 0x232   :  { %197 = vst.msk [vmem:[%s331_s6 + $0x4] sm:$0xf] %vm195_vm3, %v214_v53 }

</bundles_post_ra>
